<compile_context>
chip_gen: v7x
topology: tpu7x:2x2x1
jax: 0.10.0
libtpu: 0.0.40
codegen_flags: <defaults>
</compile_context>

<pallas_src>
import functools

import jax
import jax.numpy as jnp
from jax.experimental import pallas as pl
from jax.experimental.pallas import tpu as pltpu

RRELU_SLOPE = (1.0 / 8.0 + 1.0 / 3.0) / 2.0  # 11/48, eval-mode RReLU
LANE = 128
SUBLANE = 8


def _round_up(x, m):
    return (x + m - 1) // m * m


def _rrelu(h):
    return jnp.where(h >= 0.0, h, h * RRELU_SLOPE)


def _relu(h):
    return jnp.maximum(h, 0.0)


def mlp_kernel(x_ref,
               w1, b1, w2, b2, w3, b3, w4, b4, w5, b5, w6, b6, w7, b7,
               o_ref):
    """Whole padded MLP forward for one batch tile.

    Dot operands are bf16 (MXU fast path); accumulation and elementwise
    activations are f32. Weights/biases are resident across grid steps.
    """
    h = jnp.dot(x_ref[...], w1[...], preferred_element_type=jnp.float32) + b1[...]
    h = _rrelu(h)                                                     # RReLU
    h = jnp.dot(h.astype(jnp.bfloat16), w2[...],
                preferred_element_type=jnp.float32) + b2[...]
    h = _relu(h)                                                      # ReLU
    h = jnp.dot(h.astype(jnp.bfloat16), w3[...],
                preferred_element_type=jnp.float32) + b3[...]
    h = _relu(h)                                                      # ReLU
    h = jnp.dot(h.astype(jnp.bfloat16), w4[...],
                preferred_element_type=jnp.float32) + b4[...]
    h = _relu(h)                                                      # ReLU
    h = jnp.dot(h.astype(jnp.bfloat16), w5[...],
                preferred_element_type=jnp.float32) + b5[...]
    h = _relu(h)                                                      # ReLU
    h = jnp.dot(h.astype(jnp.bfloat16), w6[...],
                preferred_element_type=jnp.float32) + b6[...]
    h = _rrelu(h)                                                     # RReLU
    h = jnp.dot(h.astype(jnp.bfloat16), w7[...],
                preferred_element_type=jnp.float32) + b7[...]
    o_ref[...] = h                                                    # lane-dense f32 store


def init_params(key, in_features, out_features=4):
    """PyTorch-style init U(-1/sqrt(fan_in), 1/sqrt(fan_in)), then zero-pad
    every dim to a lane multiple. Weights stored bf16, biases f32.

    Zero padding is correctness-preserving for Linear + ReLU/RReLU: padded
    input columns multiply zero weight rows, padded output columns get zero
    weights and zero biases, and ReLU/RReLU(0) = 0.
    """
    dims = [in_features, 400, 300, 200, 100, 100, 50, out_features]
    pad_dims = [_round_up(d, LANE) for d in dims]
    params = []
    for i in range(len(dims) - 1):
        fan_in, fan_out = dims[i], dims[i + 1]
        p_in, p_out = pad_dims[i], pad_dims[i + 1]
        bound = 1.0 / (fan_in ** 0.5)
        key, kw, kb = jax.random.split(key, 3)
        w = jax.random.uniform(kw, (fan_in, fan_out), jnp.float32,
                               minval=-bound, maxval=bound)
        b = jax.random.uniform(kb, (fan_out,), jnp.float32,
                               minval=-bound, maxval=bound)
        w_p = jnp.zeros((p_in, p_out), jnp.bfloat16)
        w_p = w_p.at[:fan_in, :fan_out].set(w.astype(jnp.bfloat16))
        b_p = jnp.zeros((1, p_out), jnp.float32)
        b_p = b_p.at[0, :fan_out].set(b)
        params += [w_p, b_p]
    return params


@functools.partial(jax.jit, static_argnames=("out_features",))
def nn_regressor_forward(x, params, out_features=4):
    B, F = x.shape
    F_pad = params[0].shape[0]          # padded input-feature dim
    out_pad = params[-1].shape[1]       # padded output dim (128)

    # Batch tiling: multiple of 8 sublanes, up to 512 rows per step.
    TILE_B = min(512, _round_up(B, SUBLANE))
    B_pad = _round_up(B, TILE_B)

    # Zero-pad batch + features, cast activations to bf16 for the DMA / MXU.
    x_p = jnp.zeros((B_pad, F_pad), jnp.bfloat16)
    x_p = x_p.at[:B, :F].set(x.astype(jnp.bfloat16))

    grid = (B_pad // TILE_B,)

    in_specs = [pl.BlockSpec((TILE_B, F_pad), lambda i: (i, 0))]
    for p in params:
        # Constant block index -> fetched once, stays resident in VMEM.
        in_specs.append(pl.BlockSpec(p.shape, lambda i: (0, 0)))
    out_specs = pl.BlockSpec((TILE_B, out_pad), lambda i: (i, 0))

    # Advisory cost estimate (padded dims).
    layer_dims = [F_pad] + [p.shape[1] for p in params[::2]]
    flops = 2 * B_pad * sum(layer_dims[i] * layer_dims[i + 1]
                            for i in range(len(layer_dims) - 1))
    bytes_accessed = (x_p.size * x_p.dtype.itemsize
                      + sum(p.size * p.dtype.itemsize for p in params)
                      + B_pad * out_pad * 4)

    out = pl.pallas_call(
        mlp_kernel,
        out_shape=jax.ShapeDtypeStruct((B_pad, out_pad), jnp.float32),
        grid=grid,
        in_specs=in_specs,
        out_specs=out_specs,
        compiler_params=pltpu.CompilerParams(
            dimension_semantics=("parallel",),
            vmem_limit_bytes=32 * 1024 * 1024,
        ),
        cost_estimate=pl.CostEstimate(
            flops=flops, transcendentals=0, bytes_accessed=bytes_accessed),
    )(x_p, *params)

    return out[:B, :out_features]


def reference_forward(x, params, out_features=4):
    """Pure-JAX reference mirroring the kernel's bf16-operand / f32-accum math."""
    acts = [_rrelu, _relu, _relu, _relu, _relu, _rrelu, None]
    B, F = x.shape
    F_pad = params[0].shape[0]
    h = jnp.zeros((B, F_pad), jnp.float32).at[:, :F].set(x.astype(jnp.float32))
    for i, act in enumerate(acts):
        w, b = params[2 * i], params[2 * i + 1]
        h = jnp.dot(h.astype(jnp.bfloat16), w,
                    preferred_element_type=jnp.float32) + b
        if act is not None:
            h = act(h)
    return h[:, :out_features]


if __name__ == "__main__":
    B = 8
    IN_FEATURES = 32
    OUT_FEATURES = 4

    key = jax.random.PRNGKey(0)
    key, kx = jax.random.split(key)
    x = jax.random.normal(kx, (B, IN_FEATURES), jnp.float32)
    params = init_params(key, IN_FEATURES, OUT_FEATURES)

    out = nn_regressor_forward(x, params, out_features=OUT_FEATURES)
    out = jax.block_until_ready(out)

    ref = reference_forward(x, params, OUT_FEATURES)
    assert out.shape == (B, OUT_FEATURES)
    assert jnp.allclose(out, ref, atol=1e-3, rtol=1e-3), float(
        jnp.max(jnp.abs(out - ref)))

    print("KERNEL_OK")
</pallas_src>

<mosaic_0001>
module attributes {stable_mosaic.version = 11 : i64} {
  func.func @mlp_kernel(%arg0: i32, %arg1: memref<8x128xbf16, #tpu.memory_space<vmem>>, %arg2: memref<128x512xbf16, #tpu.memory_space<vmem>>, %arg3: memref<1x512xf32, #tpu.memory_space<vmem>>, %arg4: memref<512x384xbf16, #tpu.memory_space<vmem>>, %arg5: memref<1x384xf32, #tpu.memory_space<vmem>>, %arg6: memref<384x256xbf16, #tpu.memory_space<vmem>>, %arg7: memref<1x256xf32, #tpu.memory_space<vmem>>, %arg8: memref<256x128xbf16, #tpu.memory_space<vmem>>, %arg9: memref<1x128xf32, #tpu.memory_space<vmem>>, %arg10: memref<128x128xbf16, #tpu.memory_space<vmem>>, %arg11: memref<1x128xf32, #tpu.memory_space<vmem>>, %arg12: memref<128x128xbf16, #tpu.memory_space<vmem>>, %arg13: memref<1x128xf32, #tpu.memory_space<vmem>>, %arg14: memref<128x128xbf16, #tpu.memory_space<vmem>>, %arg15: memref<1x128xf32, #tpu.memory_space<vmem>>, %arg16: memref<8x128xf32, #tpu.memory_space<vmem>>) attributes {dimension_semantics = [#tpu.dimension_semantics<parallel>], iteration_bounds = array<i64: 1>, scalar_prefetch = 0 : i64, scratch_operands = 0 : i64, tpu.core_type = #tpu.core_type<tc>, window_params = [{transform_indices = @transform_0, window_bounds = array<i64: 8, 128>}, {pipeline_mode = #tpu.pipeline_mode<synchronous>, transform_indices = @transform_1, window_bounds = array<i64: 128, 512>}, {pipeline_mode = #tpu.pipeline_mode<synchronous>, transform_indices = @transform_2, window_bounds = array<i64: 1, 512>}, {pipeline_mode = #tpu.pipeline_mode<synchronous>, transform_indices = @transform_3, window_bounds = array<i64: 512, 384>}, {pipeline_mode = #tpu.pipeline_mode<synchronous>, transform_indices = @transform_4, window_bounds = array<i64: 1, 384>}, {pipeline_mode = #tpu.pipeline_mode<synchronous>, transform_indices = @transform_5, window_bounds = array<i64: 384, 256>}, {pipeline_mode = #tpu.pipeline_mode<synchronous>, transform_indices = @transform_6, window_bounds = array<i64: 1, 256>}, {pipeline_mode = #tpu.pipeline_mode<synchronous>, transform_indices = @transform_7, window_bounds = array<i64: 256, 128>}, {pipeline_mode = #tpu.pipeline_mode<synchronous>, transform_indices = @transform_8, window_bounds = array<i64: 1, 128>}, {pipeline_mode = #tpu.pipeline_mode<synchronous>, transform_indices = @transform_9, window_bounds = array<i64: 128, 128>}, {pipeline_mode = #tpu.pipeline_mode<synchronous>, transform_indices = @transform_10, window_bounds = array<i64: 1, 128>}, {pipeline_mode = #tpu.pipeline_mode<synchronous>, transform_indices = @transform_11, window_bounds = array<i64: 128, 128>}, {pipeline_mode = #tpu.pipeline_mode<synchronous>, transform_indices = @transform_12, window_bounds = array<i64: 1, 128>}, {pipeline_mode = #tpu.pipeline_mode<synchronous>, transform_indices = @transform_13, window_bounds = array<i64: 128, 128>}, {pipeline_mode = #tpu.pipeline_mode<synchronous>, transform_indices = @transform_14, window_bounds = array<i64: 1, 128>}, {transform_indices = @transform_15, window_bounds = array<i64: 8, 128>}]} {
    %c0 = arith.constant 0 : index
    %c0_0 = arith.constant 0 : index
    %0 = vector.load %arg1[%c0, %c0_0] : memref<8x128xbf16, #tpu.memory_space<vmem>>, vector<8x128xbf16>
    %c0_1 = arith.constant 0 : index
    %c0_2 = arith.constant 0 : index
    %1 = vector.load %arg2[%c0_1, %c0_2] : memref<128x512xbf16, #tpu.memory_space<vmem>>, vector<128x512xbf16>
    %cst = arith.constant dense<0.000000e+00> : vector<8x512xf32>
    %2 = tpu.matmul %0, %1, %cst {dimension_numbers = #tpu.dot_dimension_numbers<[1], [0], [0], [1], [0, 0, 1, 1], [], []>} : vector<8x128xbf16>, vector<128x512xbf16>, vector<8x512xf32> -> vector<8x512xf32>
    %c0_3 = arith.constant 0 : index
    %c0_4 = arith.constant 0 : index
    %3 = vector.load %arg3[%c0_3, %c0_4] : memref<1x512xf32, #tpu.memory_space<vmem>>, vector<1x512xf32>
    %4 = vector.broadcast %3 : vector<1x512xf32> to vector<8x512xf32>
    %5 = arith.addf %2, %4 : vector<8x512xf32>
    %cst_5 = arith.constant 0.000000e+00 : f32
    %6 = vector.broadcast %cst_5 : f32 to vector<8x512xf32>
    %7 = arith.cmpf oge, %5, %6 : vector<8x512xf32>
    %cst_6 = arith.constant 0.229166672 : f32
    %8 = vector.broadcast %cst_6 : f32 to vector<8x512xf32>
    %9 = arith.mulf %5, %8 : vector<8x512xf32>
    %10 = arith.select %7, %5, %9 : vector<8x512xi1>, vector<8x512xf32>
    %11 = arith.truncf %10 : vector<8x512xf32> to vector<8x512xbf16>
    %c0_7 = arith.constant 0 : index
    %c0_8 = arith.constant 0 : index
    %12 = vector.load %arg4[%c0_7, %c0_8] : memref<512x384xbf16, #tpu.memory_space<vmem>>, vector<512x384xbf16>
    %cst_9 = arith.constant dense<0.000000e+00> : vector<8x384xf32>
    %13 = tpu.matmul %11, %12, %cst_9 {dimension_numbers = #tpu.dot_dimension_numbers<[1], [0], [0], [1], [0, 0, 1, 1], [], []>} : vector<8x512xbf16>, vector<512x384xbf16>, vector<8x384xf32> -> vector<8x384xf32>
    %c0_10 = arith.constant 0 : index
    %c0_11 = arith.constant 0 : index
    %14 = vector.load %arg5[%c0_10, %c0_11] : memref<1x384xf32, #tpu.memory_space<vmem>>, vector<1x384xf32>
    %15 = vector.broadcast %14 : vector<1x384xf32> to vector<8x384xf32>
    %16 = arith.addf %13, %15 : vector<8x384xf32>
    %cst_12 = arith.constant 0.000000e+00 : f32
    %17 = vector.broadcast %cst_12 : f32 to vector<8x384xf32>
    %18 = arith.maximumf %16, %17 : vector<8x384xf32>
    %19 = arith.truncf %18 : vector<8x384xf32> to vector<8x384xbf16>
    %c0_13 = arith.constant 0 : index
    %c0_14 = arith.constant 0 : index
    %20 = vector.load %arg6[%c0_13, %c0_14] : memref<384x256xbf16, #tpu.memory_space<vmem>>, vector<384x256xbf16>
    %cst_15 = arith.constant dense<0.000000e+00> : vector<8x256xf32>
    %21 = tpu.matmul %19, %20, %cst_15 {dimension_numbers = #tpu.dot_dimension_numbers<[1], [0], [0], [1], [0, 0, 1, 1], [], []>} : vector<8x384xbf16>, vector<384x256xbf16>, vector<8x256xf32> -> vector<8x256xf32>
    %c0_16 = arith.constant 0 : index
    %c0_17 = arith.constant 0 : index
    %22 = vector.load %arg7[%c0_16, %c0_17] : memref<1x256xf32, #tpu.memory_space<vmem>>, vector<1x256xf32>
    %23 = vector.broadcast %22 : vector<1x256xf32> to vector<8x256xf32>
    %24 = arith.addf %21, %23 : vector<8x256xf32>
    %cst_18 = arith.constant 0.000000e+00 : f32
    %25 = vector.broadcast %cst_18 : f32 to vector<8x256xf32>
    %26 = arith.maximumf %24, %25 : vector<8x256xf32>
    %27 = arith.truncf %26 : vector<8x256xf32> to vector<8x256xbf16>
    %c0_19 = arith.constant 0 : index
    %c0_20 = arith.constant 0 : index
    %28 = vector.load %arg8[%c0_19, %c0_20] : memref<256x128xbf16, #tpu.memory_space<vmem>>, vector<256x128xbf16>
    %cst_21 = arith.constant dense<0.000000e+00> : vector<8x128xf32>
    %29 = tpu.matmul %27, %28, %cst_21 {dimension_numbers = #tpu.dot_dimension_numbers<[1], [0], [0], [1], [0, 0, 1, 1], [], []>} : vector<8x256xbf16>, vector<256x128xbf16>, vector<8x128xf32> -> vector<8x128xf32>
    %c0_22 = arith.constant 0 : index
    %c0_23 = arith.constant 0 : index
    %30 = vector.load %arg9[%c0_22, %c0_23] : memref<1x128xf32, #tpu.memory_space<vmem>>, vector<1x128xf32>
    %31 = vector.broadcast %30 : vector<1x128xf32> to vector<8x128xf32>
    %32 = arith.addf %29, %31 : vector<8x128xf32>
    %cst_24 = arith.constant 0.000000e+00 : f32
    %33 = vector.broadcast %cst_24 : f32 to vector<8x128xf32>
    %34 = arith.maximumf %32, %33 : vector<8x128xf32>
    %35 = arith.truncf %34 : vector<8x128xf32> to vector<8x128xbf16>
    %c0_25 = arith.constant 0 : index
    %c0_26 = arith.constant 0 : index
    %36 = vector.load %arg10[%c0_25, %c0_26] : memref<128x128xbf16, #tpu.memory_space<vmem>>, vector<128x128xbf16>
    %cst_27 = arith.constant dense<0.000000e+00> : vector<8x128xf32>
    %37 = tpu.matmul %35, %36, %cst_27 {dimension_numbers = #tpu.dot_dimension_numbers<[1], [0], [0], [1], [0, 0, 1, 1], [], []>} : vector<8x128xbf16>, vector<128x128xbf16>, vector<8x128xf32> -> vector<8x128xf32>
    %c0_28 = arith.constant 0 : index
    %c0_29 = arith.constant 0 : index
    %38 = vector.load %arg11[%c0_28, %c0_29] : memref<1x128xf32, #tpu.memory_space<vmem>>, vector<1x128xf32>
    %39 = vector.broadcast %38 : vector<1x128xf32> to vector<8x128xf32>
    %40 = arith.addf %37, %39 : vector<8x128xf32>
    %cst_30 = arith.constant 0.000000e+00 : f32
    %41 = vector.broadcast %cst_30 : f32 to vector<8x128xf32>
    %42 = arith.maximumf %40, %41 : vector<8x128xf32>
    %43 = arith.truncf %42 : vector<8x128xf32> to vector<8x128xbf16>
    %c0_31 = arith.constant 0 : index
    %c0_32 = arith.constant 0 : index
    %44 = vector.load %arg12[%c0_31, %c0_32] : memref<128x128xbf16, #tpu.memory_space<vmem>>, vector<128x128xbf16>
    %cst_33 = arith.constant dense<0.000000e+00> : vector<8x128xf32>
    %45 = tpu.matmul %43, %44, %cst_33 {dimension_numbers = #tpu.dot_dimension_numbers<[1], [0], [0], [1], [0, 0, 1, 1], [], []>} : vector<8x128xbf16>, vector<128x128xbf16>, vector<8x128xf32> -> vector<8x128xf32>
    %c0_34 = arith.constant 0 : index
    %c0_35 = arith.constant 0 : index
    %46 = vector.load %arg13[%c0_34, %c0_35] : memref<1x128xf32, #tpu.memory_space<vmem>>, vector<1x128xf32>
    %47 = vector.broadcast %46 : vector<1x128xf32> to vector<8x128xf32>
    %48 = arith.addf %45, %47 : vector<8x128xf32>
    %cst_36 = arith.constant 0.000000e+00 : f32
    %49 = vector.broadcast %cst_36 : f32 to vector<8x128xf32>
    %50 = arith.cmpf oge, %48, %49 : vector<8x128xf32>
    %cst_37 = arith.constant 0.229166672 : f32
    %51 = vector.broadcast %cst_37 : f32 to vector<8x128xf32>
    %52 = arith.mulf %48, %51 : vector<8x128xf32>
    %53 = arith.select %50, %48, %52 : vector<8x128xi1>, vector<8x128xf32>
    %54 = arith.truncf %53 : vector<8x128xf32> to vector<8x128xbf16>
    %c0_38 = arith.constant 0 : index
    %c0_39 = arith.constant 0 : index
    %55 = vector.load %arg14[%c0_38, %c0_39] : memref<128x128xbf16, #tpu.memory_space<vmem>>, vector<128x128xbf16>
    %cst_40 = arith.constant dense<0.000000e+00> : vector<8x128xf32>
    %56 = tpu.matmul %54, %55, %cst_40 {dimension_numbers = #tpu.dot_dimension_numbers<[1], [0], [0], [1], [0, 0, 1, 1], [], []>} : vector<8x128xbf16>, vector<128x128xbf16>, vector<8x128xf32> -> vector<8x128xf32>
    %c0_41 = arith.constant 0 : index
    %c0_42 = arith.constant 0 : index
    %57 = vector.load %arg15[%c0_41, %c0_42] : memref<1x128xf32, #tpu.memory_space<vmem>>, vector<1x128xf32>
    %58 = vector.broadcast %57 : vector<1x128xf32> to vector<8x128xf32>
    %59 = arith.addf %56, %58 : vector<8x128xf32>
    %c0_43 = arith.constant 0 : index
    %c0_44 = arith.constant 0 : index
    %60 = vector.load %arg16[%c0_43, %c0_44] : memref<8x128xf32, #tpu.memory_space<vmem>>, vector<8x128xf32>
    tpu.vector_store %arg16[%c0_43, %c0_44], %59 {strides = array<i32>} : memref<8x128xf32, #tpu.memory_space<vmem>>, vector<8x128xf32>,
    return
  }
  func.func @transform_0(%arg0: i32) -> (i32, i32) {
    %c0_i32 = arith.constant 0 : i32
    %c0_i32_0 = arith.constant 0 : i32
    return %arg0, %c0_i32 : i32, i32
  }
  func.func @transform_1(%arg0: i32) -> (i32, i32) {
    %c0_i32 = arith.constant 0 : i32
    %c0_i32_0 = arith.constant 0 : i32
    %c0_i32_1 = arith.constant 0 : i32
    return %c0_i32, %c0_i32_0 : i32, i32
  }
  func.func @transform_2(%arg0: i32) -> (i32, i32) {
    %c0_i32 = arith.constant 0 : i32
    %c0_i32_0 = arith.constant 0 : i32
    %c0_i32_1 = arith.constant 0 : i32
    return %c0_i32, %c0_i32_0 : i32, i32
  }
  func.func @transform_3(%arg0: i32) -> (i32, i32) {
    %c0_i32 = arith.constant 0 : i32
    %c0_i32_0 = arith.constant 0 : i32
    %c0_i32_1 = arith.constant 0 : i32
    return %c0_i32, %c0_i32_0 : i32, i32
  }
  func.func @transform_4(%arg0: i32) -> (i32, i32) {
    %c0_i32 = arith.constant 0 : i32
    %c0_i32_0 = arith.constant 0 : i32
    %c0_i32_1 = arith.constant 0 : i32
    return %c0_i32, %c0_i32_0 : i32, i32
  }
  func.func @transform_5(%arg0: i32) -> (i32, i32) {
    %c0_i32 = arith.constant 0 : i32
    %c0_i32_0 = arith.constant 0 : i32
    %c0_i32_1 = arith.constant 0 : i32
    return %c0_i32, %c0_i32_0 : i32, i32
  }
  func.func @transform_6(%arg0: i32) -> (i32, i32) {
    %c0_i32 = arith.constant 0 : i32
    %c0_i32_0 = arith.constant 0 : i32
    %c0_i32_1 = arith.constant 0 : i32
    return %c0_i32, %c0_i32_0 : i32, i32
  }
  func.func @transform_7(%arg0: i32) -> (i32, i32) {
    %c0_i32 = arith.constant 0 : i32
    %c0_i32_0 = arith.constant 0 : i32
    %c0_i32_1 = arith.constant 0 : i32
    return %c0_i32, %c0_i32_0 : i32, i32
  }
  func.func @transform_8(%arg0: i32) -> (i32, i32) {
    %c0_i32 = arith.constant 0 : i32
    %c0_i32_0 = arith.constant 0 : i32
    %c0_i32_1 = arith.constant 0 : i32
    return %c0_i32, %c0_i32_0 : i32, i32
  }
  func.func @transform_9(%arg0: i32) -> (i32, i32) {
    %c0_i32 = arith.constant 0 : i32
    %c0_i32_0 = arith.constant 0 : i32
    %c0_i32_1 = arith.constant 0 : i32
    return %c0_i32, %c0_i32_0 : i32, i32
  }
  func.func @transform_10(%arg0: i32) -> (i32, i32) {
    %c0_i32 = arith.constant 0 : i32
    %c0_i32_0 = arith.constant 0 : i32
    %c0_i32_1 = arith.constant 0 : i32
    return %c0_i32, %c0_i32_0 : i32, i32
  }
  func.func @transform_11(%arg0: i32) -> (i32, i32) {
    %c0_i32 = arith.constant 0 : i32
    %c0_i32_0 = arith.constant 0 : i32
    %c0_i32_1 = arith.constant 0 : i32
    return %c0_i32, %c0_i32_0 : i32, i32
  }
  func.func @transform_12(%arg0: i32) -> (i32, i32) {
    %c0_i32 = arith.constant 0 : i32
    %c0_i32_0 = arith.constant 0 : i32
    %c0_i32_1 = arith.constant 0 : i32
    return %c0_i32, %c0_i32_0 : i32, i32
  }
  func.func @transform_13(%arg0: i32) -> (i32, i32) {
    %c0_i32 = arith.constant 0 : i32
    %c0_i32_0 = arith.constant 0 : i32
    %c0_i32_1 = arith.constant 0 : i32
    return %c0_i32, %c0_i32_0 : i32, i32
  }
  func.func @transform_14(%arg0: i32) -> (i32, i32) {
    %c0_i32 = arith.constant 0 : i32
    %c0_i32_0 = arith.constant 0 : i32
    %c0_i32_1 = arith.constant 0 : i32
    return %c0_i32, %c0_i32_0 : i32, i32
  }
  func.func @transform_15(%arg0: i32) -> (i32, i32) {
    %c0_i32 = arith.constant 0 : i32
    %c0_i32_0 = arith.constant 0 : i32
    return %arg0, %c0_i32 : i32, i32
  }
}

</mosaic_0001>

<bundles_post_ra>
// kernel: nn_regressor_forward.1
= control target key start
LH: loop header
LB: loop body
LE: loop exit
PB: predicated region body
PF: predicated region fallthrough
CT: control target
= control target key end

     0   :  { %20 = vsyncpa [#allocation3], 0  ;;  %s3498_s0 = inlined_call_operand.vmem [shape: bf16[8,128], index: 0, kind: input, shape index: {}]   ;;  %s3499_s1 = inlined_call_operand.hbm [shape: bf16[128,512], index: 1, kind: input, shape index: {}]   ;;  %s3500_s2 = inlined_call_operand.hbm [shape: f32[1,512], index: 2, kind: input, shape index: {}]   ;;  %s3501_s3 = inlined_call_operand.hbm [shape: bf16[512,384], index: 3, kind: input, shape index: {}]   ;;  %s3502_s4 = inlined_call_operand.vmem [shape: f32[1,384], index: 4, kind: input, shape index: {}]   ;;  %s3503_s5 = inlined_call_operand.hbm [shape: bf16[384,256], index: 5, kind: input, shape index: {}]   ;;  %s3504_s6 = inlined_call_operand.hbm [shape: f32[1,256], index: 6, kind: input, shape index: {}]   ;;  %s3505_s7 = inlined_call_operand.hbm [shape: bf16[256,128], index: 7, kind: input, shape index: {}]   ;;  %s3506_s8 = inlined_call_operand.hbm [shape: f32[1,128], index: 8, kind: input, shape index: {}]   ;;  %s3507_s9 = inlined_call_operand.hbm [shape: bf16[128,128], index: 9, kind: input, shape index: {}]   ;;  %s3508_s10 = inlined_call_operand.hbm [shape: f32[1,128], index: 10, kind: input, shape index: {}]   ;;  %s3509_s11 = inlined_call_operand.vmem [shape: bf16[128,128], index: 11, kind: input, shape index: {}]   ;;  %s3510_s12 = inlined_call_operand.vmem [shape: f32[1,128], index: 12, kind: input, shape index: {}]   ;;  %s3511_s13 = inlined_call_operand.hbm [shape: bf16[128,128], index: 13, kind: input, shape index: {}]   ;;  %s3512_s14 = inlined_call_operand.vmem [shape: f32[1,128], index: 14, kind: input, shape index: {}]   ;;  %s3513_s15 = inlined_call_operand.vmem [shape: f32[8,128], index: 15, kind: output, shape index: {}]  }
   0x1   :  { %21 = vsyncpa [#allocation5], 0 }
   0x2   :  { %22 = vsyncpa [#allocation8], 0 }
   0x3   :  { %23 = vsyncpa [#allocation11], 0 }
   0x4   :  { %24 = vsyncpa [#allocation14], 0 }
   0x5   :  { %25 = vsyncpa [#allocation17], 0  ;;  %s3156_s18 = smov [#allocation4]   ;;  %s3157_s20 = smov [#allocation7]  }
   0x6   :  { %s46_s19 = sshll.u32 %s3156_s18, 4  ;;  %s69_s21 = sshll.u32 %s3157_s20, 4  ;;  %s47_s19 = int_to_ptr.vmem [resolvable:$true] %s46_s19  ;;  %s3257_s21 = int_to_ptr.vmem [resolvable:$true] %s69_s21 }
   0x7   :  { %s2924_s24 = scalar_lea.hbm %s3500_s2, 64 }
   0x8   :  { %p2925_p0 = scmp.ne.s32.totalorder %s3500_s2, %s2924_s24  ;;  %p2928_p1 = scmp.lt.u32.totalorder %s2924_s24, %s3500_s2 }
   0xa   :  { %p2930_p2 = pnand %p2928_p1, %p2925_p0 }
   0xc   :  { %2933 = shalt.err (!%p2930_p2)
}
   0xd   :  { %s2934_s29 = scalar_lea.vmem %s47_s19, 64  ;;  %p2939_p4 = scmp.lt.s32.totalorder %s47_s19, %s47_s19 }
   0xe   :  { %p2935_p3 = scmp.ne.s32.totalorder %s47_s19, %s2934_s29  ;;  %p2940_p5 = scmp.lt.s32.totalorder %s2934_s29, %s2934_s29 }
  0x10   :  { %p2941_p6 = por %p2940_p5, %p2939_p4 }
  0x12   :  { %p2942_p7 = pnand %p2941_p6, %p2935_p3 }
  0x14   :  { %2945 = shalt.err (!%p2942_p7)
}
  0x15   :  { %49 = dma.hbm_to_vmem [thread:$0]  %s3500_s2, 64, %s47_s19, [#allocation5]  }
  0x16   :  { %s2946_s20 = scalar_lea.hbm %s3503_s5, 6144 }
  0x17   :  { %p2947_p8 = scmp.ne.s32.totalorder %s3503_s5, %s2946_s20  ;;  %p2950_p9 = scmp.lt.u32.totalorder %s2946_s20, %s3503_s5 }
  0x19   :  { %p2952_p10 = pnand %p2950_p9, %p2947_p8 }
  0x1b   :  { %2955 = shalt.err (!%p2952_p10)
}
  0x1c   :  { %s2956_s26 = scalar_lea.vmem %s3257_s21, 6144  ;;  %p2961_p12 = scmp.lt.s32.totalorder %s3257_s21, %s3257_s21 }
  0x1d   :  { %p2957_p11 = scmp.ne.s32.totalorder %s3257_s21, %s2956_s26  ;;  %p2962_p13 = scmp.lt.s32.totalorder %s2956_s26, %s2956_s26 }
  0x1f   :  { %p2963_p0 = por %p2962_p13, %p2961_p12 }
  0x21   :  { %p2964_p1 = pnand %p2963_p0, %p2957_p11 }
  0x23   :  { %2967 = shalt.err (!%p2964_p1)
}
  0x24   :  { %s3158_s2 = smov 128   ;;  %s3159_s19 = smov 8  }
  0x25   :  { %75 = dma.hbm_to_vmem [thread:$0]  %s3503_s5, 6144, %s3257_s21, [#allocation8], %s3158_s2, %s3158_s2, %s3159_s19  }
  0x26   :  { %s3160_s29 = smov [#allocation10]   ;;  %s2968_s18 = scalar_lea.hbm %s3505_s7, 2048 }
  0x27   :  { %s91_s30 = sshll.u32 %s3160_s29, 4  ;;  %p2969_p2 = scmp.ne.s32.totalorder %s3505_s7, %s2968_s18  ;;  %s92_s30 = int_to_ptr.vmem [resolvable:$true] %s91_s30 }
  0x28   :  { %p2972_p3 = scmp.lt.u32.totalorder %s2968_s18, %s3505_s7 }
  0x2a   :  { %p2974_p4 = pnand %p2972_p3, %p2969_p2 }
  0x2c   :  { %2977 = shalt.err (!%p2974_p4)
}
  0x2d   :  { %s2978_s25 = scalar_lea.vmem %s92_s30, 2048  ;;  %p2983_p6 = scmp.lt.s32.totalorder %s92_s30, %s92_s30 }
  0x2e   :  { %p2979_p5 = scmp.ne.s32.totalorder %s92_s30, %s2978_s25  ;;  %p2984_p7 = scmp.lt.s32.totalorder %s2978_s25, %s2978_s25 }
  0x30   :  { %p2985_p8 = por %p2984_p7, %p2983_p6 }
  0x32   :  { %p2986_p9 = pnand %p2985_p8, %p2979_p5 }
  0x34   :  { %2989 = shalt.err (!%p2986_p9)
}
  0x35   :  { %s3161_s5 = smov 64   ;;  %s3162_s21 = smov 4  }
  0x36   :  { %97 = dma.hbm_to_vmem [thread:$0]  %s3505_s7, 2048, %s92_s30, [#allocation11], %s3161_s5, %s3161_s5, %s3162_s21  }
  0x37   :  { %s3163_s19 = smov [#allocation13]   ;;  %s3164_s28 = smov [#allocation2]  }
  0x38   :  { %s113_s27 = sshll.u32 %s3163_s19, 4  ;;  %s33_s29 = sshll.u32 %s3164_s28, 4  ;;  %s114_s27 = int_to_ptr.vmem [resolvable:$true] %s113_s27  ;;  %s34_s29 = int_to_ptr.vmem [resolvable:$true] %s33_s29 }
  0x39   :  { %s2990_s18 = scalar_lea.hbm %s3507_s9, 1024 }
  0x3a   :  { %p2991_p10 = scmp.ne.s32.totalorder %s3507_s9, %s2990_s18  ;;  %p2994_p11 = scmp.lt.u32.totalorder %s2990_s18, %s3507_s9 }
  0x3c   :  { %p2996_p12 = pnand %p2994_p11, %p2991_p10 }
  0x3e   :  { %2999 = shalt.err (!%p2996_p12)
}
  0x3f   :  { %s3000_s7 = scalar_lea.vmem %s114_s27, 1024  ;;  %p3005_p0 = scmp.lt.s32.totalorder %s114_s27, %s114_s27 }
  0x40   :  { %p3001_p13 = scmp.ne.s32.totalorder %s114_s27, %s3000_s7  ;;  %p3006_p1 = scmp.lt.s32.totalorder %s3000_s7, %s3000_s7 }
  0x42   :  { %p3007_p2 = por %p3006_p1, %p3005_p0 }
  0x44   :  { %p3008_p3 = pnand %p3007_p2, %p3001_p13 }
  0x46   :  { %3011 = shalt.err (!%p3008_p3)
}
  0x47   :  { %119 = dma.hbm_to_vmem [thread:$0]  %s3507_s9, 1024, %s114_s27, [#allocation14], %s3161_s5, %s3161_s5, %s3162_s21  }
  0x48   :  { %s3012_s19 = scalar_lea.hbm %s3499_s1, 4096 }
  0x49   :  { %p3013_p4 = scmp.ne.s32.totalorder %s3499_s1, %s3012_s19  ;;  %p3016_p5 = scmp.lt.u32.totalorder %s3012_s19, %s3499_s1 }
  0x4b   :  { %p3018_p6 = pnand %p3016_p5, %p3013_p4 }
  0x4d   :  { %3021 = shalt.err (!%p3018_p6)
}
  0x4e   :  { %s3022_s20 = scalar_lea.vmem %s34_s29, 4096  ;;  %p3027_p8 = scmp.lt.s32.totalorder %s34_s29, %s34_s29 }
  0x4f   :  { %p3023_p7 = scmp.ne.s32.totalorder %s34_s29, %s3022_s20  ;;  %p3028_p9 = scmp.lt.s32.totalorder %s3022_s20, %s3022_s20 }
  0x51   :  { %p3029_p10 = por %p3028_p9, %p3027_p8 }
  0x53   :  { %p3030_p11 = pnand %p3029_p10, %p3023_p7 }
  0x55   :  { %3033 = shalt.err (!%p3030_p11)
}
  0x56   :  { %s3165_s9 = smov 256   ;;  %s3166_s27 = smov 16  }
  0x57   :  { %39 = dma.hbm_to_vmem [thread:$0]  %s3499_s1, 4096, %s34_s29, [#allocation3], %s3165_s9, %s3165_s9, %s3166_s27  }
  0x58   :  { %s3167_s24 = smov [#allocation6]   ;;  %s3034_s26 = scalar_lea.hbm %s3501_s3, 12288 }
  0x59   :  { %s55_s7 = sshll.u32 %s3167_s24, 4  ;;  %p3035_p12 = scmp.ne.s32.totalorder %s3501_s3, %s3034_s26  ;;  %s56_s7 = int_to_ptr.vmem [resolvable:$true] %s55_s7 }
  0x5a   :  { %p3038_p13 = scmp.lt.u32.totalorder %s3034_s26, %s3501_s3 }
  0x5c   :  { %p3040_p0 = pnand %p3038_p13, %p3035_p12 }
  0x5e   :  { %3043 = shalt.err (!%p3040_p0)
}
  0x5f   :  { %s3044_s17 = scalar_lea.vmem %s56_s7, 12288  ;;  %p3049_p2 = scmp.lt.s32.totalorder %s56_s7, %s56_s7 }
  0x60   :  { %p3045_p1 = scmp.ne.s32.totalorder %s56_s7, %s3044_s17  ;;  %p3050_p3 = scmp.lt.s32.totalorder %s3044_s17, %s3044_s17 }
  0x62   :  { %p3051_p4 = por %p3050_p3, %p3049_p2 }
  0x64   :  { %p3052_p5 = pnand %p3051_p4, %p3045_p1 }
  0x66   :  { %3055 = shalt.err (!%p3052_p5)
}
  0x67   :  { %s3168_s1 = smov 192   ;;  %s3169_s29 = smov 12  }
  0x68   :  { %61 = dma.hbm_to_vmem [thread:$0]  %s3501_s3, 12288, %s56_s7, [#allocation5], %s3168_s1, %s3168_s1, %s3169_s29  }
  0x69   :  { %s3170_s9 = smov [#allocation9]   ;;  %s3171_s22 = smov [#allocation12]  }
  0x6a   :  { %s82_s27 = sshll.u32 %s3170_s9, 4  ;;  %s104_s23 = sshll.u32 %s3171_s22, 4  ;;  %s83_s27 = int_to_ptr.vmem [resolvable:$true] %s82_s27  ;;  %s105_s23 = int_to_ptr.vmem [resolvable:$true] %s104_s23 }
  0x6b   :  { %s3056_s25 = scalar_lea.hbm %s3504_s6, 32 }
  0x6c   :  { %p3057_p6 = scmp.ne.s32.totalorder %s3504_s6, %s3056_s25  ;;  %p3060_p7 = scmp.lt.u32.totalorder %s3056_s25, %s3504_s6 }
  0x6e   :  { %p3062_p8 = pnand %p3060_p7, %p3057_p6 }
  0x70   :  { %3065 = shalt.err (!%p3062_p8)
}
  0x71   :  { %s3066_s3 = scalar_lea.vmem %s83_s27, 32  ;;  %p3071_p10 = scmp.lt.s32.totalorder %s83_s27, %s83_s27 }
  0x72   :  { %p3067_p9 = scmp.ne.s32.totalorder %s83_s27, %s3066_s3  ;;  %p3072_p11 = scmp.lt.s32.totalorder %s3066_s3, %s3066_s3 }
  0x74   :  { %p3073_p12 = por %p3072_p11, %p3071_p10 }
  0x76   :  { %p3074_p13 = pnand %p3073_p12, %p3067_p9 }
  0x78   :  { %3077 = shalt.err (!%p3074_p13)
}
  0x79   :  { %85 = dma.hbm_to_vmem [thread:$0]  %s3504_s6, 32, %s83_s27, [#allocation8]  }
  0x7a   :  { %s3078_s29 = scalar_lea.hbm %s3506_s8, 16 }
  0x7b   :  { %p3079_p0 = scmp.ne.s32.totalorder %s3506_s8, %s3078_s29  ;;  %p3082_p1 = scmp.lt.u32.totalorder %s3078_s29, %s3506_s8 }
  0x7d   :  { %p3084_p2 = pnand %p3082_p1, %p3079_p0 }
  0x7f   :  { %3087 = shalt.err (!%p3084_p2)
}
  0x80   :  { %s3088_s24 = scalar_lea.vmem %s105_s23, 16  ;;  %s3092_s30 = scalar_lea.vmem %s105_s23, 32 }
  0x81   :  { %p3089_p3 = scmp.ne.s32.totalorder %s105_s23, %s3088_s24  ;;  %p3093_p4 = scmp.lt.s32.totalorder %s105_s23, %s105_s23 }
  0x82   :  { %p3094_p5 = scmp.lt.s32.totalorder %s3092_s30, %s3088_s24 }
  0x84   :  { %p3095_p6 = por %p3094_p5, %p3093_p4 }
  0x86   :  { %p3096_p7 = pnand %p3095_p6, %p3089_p3 }
  0x88   :  { %3099 = shalt.err (!%p3096_p7)
}
  0x89   :  { %107 = dma.hbm_to_vmem [thread:$0]  %s3506_s8, 16, %s105_s23, [#allocation11]  }
  0x8a   :  { %s3172_s25 = smov [#allocation15]   ;;  %s3173_s2 = smov [#allocation16]  }
  0x8b   :  { %s126_s26 = sshll.u32 %s3172_s25, 4  ;;  %s139_s19 = sshll.u32 %s3173_s2, 4  ;;  %s127_s26 = int_to_ptr.vmem [resolvable:$true] %s126_s26  ;;  %s3366_s19 = int_to_ptr.vmem [resolvable:$true] %s139_s19 }
  0x8c   :  { %s3100_s7 = scalar_lea.hbm %s3508_s10, 16 }
  0x8d   :  { %p3101_p8 = scmp.ne.s32.totalorder %s3508_s10, %s3100_s7  ;;  %p3104_p9 = scmp.lt.u32.totalorder %s3100_s7, %s3508_s10 }
  0x8f   :  { %p3106_p10 = pnand %p3104_p9, %p3101_p8 }
  0x91   :  { %3109 = shalt.err (!%p3106_p10)
}
  0x92   :  { %s3110_s8 = scalar_lea.vmem %s127_s26, 16  ;;  %s3114_s23 = scalar_lea.vmem %s127_s26, 32 }
  0x93   :  { %p3111_p11 = scmp.ne.s32.totalorder %s127_s26, %s3110_s8  ;;  %p3115_p12 = scmp.lt.s32.totalorder %s127_s26, %s127_s26 }
  0x94   :  { %p3116_p13 = scmp.lt.s32.totalorder %s3114_s23, %s3110_s8 }
  0x96   :  { %p3117_p0 = por %p3116_p13, %p3115_p12 }
  0x98   :  { %p3118_p1 = pnand %p3117_p0, %p3111_p11 }
  0x9a   :  { %3121 = shalt.err (!%p3118_p1)
}
  0x9b   :  { %129 = dma.hbm_to_vmem [thread:$0]  %s3508_s10, 16, %s127_s26, [#allocation14]  }
  0x9c   :  { %s3122_s24 = scalar_lea.hbm %s3511_s13, 1024 }
  0x9d   :  { %p3123_p2 = scmp.ne.s32.totalorder %s3511_s13, %s3122_s24  ;;  %p3126_p3 = scmp.lt.u32.totalorder %s3122_s24, %s3511_s13 }
  0x9f   :  { %p3128_p4 = pnand %p3126_p3, %p3123_p2 }
  0xa1   :  { %3131 = shalt.err (!%p3128_p4)
}
  0xa2   :  { %s3132_s2 = scalar_lea.vmem %s3366_s19, 1024  ;;  %p3137_p6 = scmp.lt.s32.totalorder %s3366_s19, %s3366_s19 }
  0xa3   :  { %p3133_p5 = scmp.ne.s32.totalorder %s3366_s19, %s3132_s2  ;;  %p3138_p7 = scmp.lt.s32.totalorder %s3132_s2, %s3132_s2 }
  0xa5   :  { %p3139_p8 = por %p3138_p7, %p3137_p6 }
  0xa7   :  { %p3140_p9 = pnand %p3139_p8, %p3133_p5 }
  0xa9   :  { %3143 = shalt.err (!%p3140_p9)
}
  0xaa   :  { %145 = dma.hbm_to_vmem [thread:$0]  %s3511_s13, 1024, %s3366_s19, [#allocation17], %s3161_s5, %s3161_s5, %s3162_s21  }
  0xab   :  { %3144 = dma.done.wait [#allocation3], 4096  }
  0xac   :  { %3145 = vsyncadd [#allocation3], 4294963200 }
  0xad   :  { %3146 = dma.done.wait [#allocation5], 12352  }
  0xae   :  { %3147 = vsyncadd [#allocation5], 4294954944 }
  0xaf   :  { %3148 = dma.done.wait [#allocation8], 6176  }
  0xb0   :  { %3149 = vsyncadd [#allocation8], 4294961120 }
  0xb1   :  { %3150 = dma.done.wait [#allocation11], 2064  }
  0xb2   :  { %3151 = vsyncadd [#allocation11], 4294965232 }
  0xb3   :  { %3152 = dma.done.wait [#allocation14], 1040  }
  0xb4   :  { %3153 = vsyncadd [#allocation14], 4294966256 }
  0xb5   :  { %3154 = dma.done.wait [#allocation17], 1024  }
  0xb6   :  { %3155 = vsyncadd [#allocation17], 4294966272  ;;  %v3174_v0 = vmov 0   ;;  %v2636_v1 = vld [vmem:[#allocation2 + $0x4] ss:$16 sps:$4 sm:$0xff]   ;;  %vm3176_vm4 = vmmov 0  }
  0xb7   :  { %426 = vmatprep.mubr.bf16.mxu0 %v3174_v0  ;;  %467 = vmatprep.mubr.bf16.mxu1 %v3174_v0  ;;  %v2638_v2 = vld [vmem:[#allocation2] ss:$16 sps:$4 sm:$0xff]   ;;  %v2639_v3 = vld [vmem:[#allocation2 + $0x24] ss:$16 sps:$4 sm:$0xff]   ;;  %v2660_v10 = vld [vmem:[#allocation2 + $0xc] ss:$16 sps:$4 sm:$0xff]  }
  0xb8   :  { %394 = vmatprep.subr.bf16.mxu0 %v2636_v1  ;;  %v2641_v4 = vld [vmem:[#allocation2 + $0x20] ss:$16 sps:$4 sm:$0xff]   ;;  %v2642_v5 = vld [vmem:[#allocation2 + $0x44] ss:$16 sps:$4 sm:$0xff]   ;;  %v2662_v11 = vld [vmem:[#allocation2 + $0x8] ss:$16 sps:$4 sm:$0xff]   ;;  %435 = vmatprep.subr.bf16.mxu1 %v2660_v10 }
  0xb9   :  { %395 = vmatpush1.bf16.msra.mxu0 %v2638_v2  ;;  %v2644_v6 = vld [vmem:[#allocation2 + $0x40] ss:$16 sps:$4 sm:$0xff]   ;;  %v2645_v7 = vld [vmem:[#allocation2 + $0x64] ss:$16 sps:$4 sm:$0xff]   ;;  %v2663_v12 = vld [vmem:[#allocation2 + $0x2c] ss:$16 sps:$4 sm:$0xff]   ;;  %436 = vmatpush1.bf16.msra.mxu1 %v2662_v11 }
  0xba   :  { %396 = vmatprep.subr.bf16.mxu0 %v2639_v3  ;;  %v2647_v8 = vld [vmem:[#allocation2 + $0x60] ss:$16 sps:$4 sm:$0xff]   ;;  %v2648_v9 = vld [vmem:[#allocation2 + $0x84] ss:$16 sps:$4 sm:$0xff]   ;;  %v2665_v14 = vld [vmem:[#allocation2 + $0x28] ss:$16 sps:$4 sm:$0xff]   ;;  %437 = vmatprep.subr.bf16.mxu1 %v2663_v12 }
  0xbb   :  { %v2650_v13 = vld [vmem:[#allocation2 + $0x80] ss:$16 sps:$4 sm:$0xff]   ;;  %v2666_v15 = vld [vmem:[#allocation2 + $0x4c] ss:$16 sps:$4 sm:$0xff]   ;;  %v2651_v16 = vld [vmem:[#allocation2 + $0xa4] ss:$16 sps:$4 sm:$0xff]  }
  0xbc   :  { %v2653_v17 = vld [vmem:[#allocation2 + $0xa0] ss:$16 sps:$4 sm:$0xff]   ;;  %v2668_v18 = vld [vmem:[#allocation2 + $0x48] ss:$16 sps:$4 sm:$0xff]   ;;  %v2669_v19 = vld [vmem:[#allocation2 + $0x6c] ss:$16 sps:$4 sm:$0xff]  }
  0xbd   :  { %397 = vmatpush1.bf16.msra.mxu0 %v2641_v4  ;;  %438 = vmatpush1.bf16.msra.mxu1 %v2665_v14  ;;  %v2654_v20 = vld [vmem:[#allocation2 + $0xc4] ss:$16 sps:$4 sm:$0xff]   ;;  %v2656_v21 = vld [vmem:[#allocation2 + $0xc0] ss:$16 sps:$4 sm:$0xff]   ;;  %v2671_v22 = vld [vmem:[#allocation2 + $0x68] ss:$16 sps:$4 sm:$0xff]  }
  0xbe   :  { %398 = vmatprep.subr.bf16.mxu0 %v2642_v5  ;;  %439 = vmatprep.subr.bf16.mxu1 %v2666_v15  ;;  %v2672_v23 = vld [vmem:[#allocation2 + $0x8c] ss:$16 sps:$4 sm:$0xff]   ;;  %v2657_v24 = vld [vmem:[#allocation2 + $0xe4] ss:$16 sps:$4 sm:$0xff]   ;;  %v2659_v25 = vld [vmem:[#allocation2 + $0xe0] ss:$16 sps:$4 sm:$0xff]  }
  0xbf   :  { %v2674_v26 = vld [vmem:[#allocation2 + $0x88] ss:$16 sps:$4 sm:$0xff]   ;;  %v2675_v27 = vld [vmem:[#allocation2 + $0xac] ss:$16 sps:$4 sm:$0xff]   ;;  %v179_v29 = vld [vmem:[%s3498_s0] sm:$0xf] }
  0xc0   :  { %v2686_v28 = vld [vmem:[#allocation6 + $0x4] ss:$12 sps:$4 sm:$0xff]   ;;  %v2678_v31 = vld [vmem:[#allocation2 + $0xcc] ss:$16 sps:$4 sm:$0xff]   ;;  %v2684_v32 = vld [vmem:[#allocation6] ss:$12 sps:$4 sm:$0xff]  }
  0xc1   :  { %399 = vmatpush1.bf16.msra.mxu0 %v2644_v6  ;;  %440 = vmatpush1.bf16.msra.mxu1 %v2668_v18  ;;  %v2677_v30 = vld [vmem:[#allocation2 + $0xa8] ss:$16 sps:$4 sm:$0xff]   ;;  %v2689_v33 = vld [vmem:[#allocation6 + $0x1c] ss:$12 sps:$4 sm:$0xff]   ;;  %v2695_v41 = vld [vmem:[#allocation6 + $0x4c] ss:$12 sps:$4 sm:$0xff]  }
  0xc2   :  { %400 = vmatprep.subr.bf16.mxu0 %v2645_v7  ;;  %441 = vmatprep.subr.bf16.mxu1 %v2669_v19  ;;  %v2680_v34 = vld [vmem:[#allocation2 + $0xc8] ss:$16 sps:$4 sm:$0xff]   ;;  %v2681_v35 = vld [vmem:[#allocation2 + $0xec] ss:$16 sps:$4 sm:$0xff]   ;;  %v2690_v39 = vld [vmem:[#allocation6 + $0x30] ss:$12 sps:$4 sm:$0xff]  }
  0xc3   :  { %v2687_v36 = vld [vmem:[#allocation6 + $0x18] ss:$12 sps:$4 sm:$0xff]   ;;  %v2692_v37 = vld [vmem:[#allocation6 + $0x34] ss:$12 sps:$4 sm:$0xff]   ;;  %v2701_v49 = vld [vmem:[#allocation6 + $0x7c] ss:$12 sps:$4 sm:$0xff]  }
  0xc4   :  { %v2683_v38 = vld [vmem:[#allocation2 + $0xe8] ss:$16 sps:$4 sm:$0xff]   ;;  %v2716_v44 = vld [vmem:[#allocation6 + $0xe0] ss:$12 sps:$4 sm:$0xff]   ;;  %v2726_v52 = vld [vmem:[#allocation6 + $0x110] ss:$12 sps:$4 sm:$0xff]  }
  0xc5   :  { %401 = vmatpush1.bf16.msra.mxu0 %v2647_v8  ;;  %442 = vmatpush1.bf16.msra.mxu1 %v2671_v22  ;;  %v2711_v40 = vld [vmem:[#allocation6 + $0xc8] ss:$12 sps:$4 sm:$0xff]   ;;  %v2698_v45 = vld [vmem:[#allocation6 + $0x64] ss:$12 sps:$4 sm:$0xff]   ;;  %v2696_v46 = vld [vmem:[#allocation6 + $0x60] ss:$12 sps:$4 sm:$0xff]  }
  0xc6   :  { %402 = vmatprep.subr.bf16.mxu0 %v2648_v9  ;;  %443 = vmatprep.subr.bf16.mxu1 %v2672_v23  ;;  %v2712_v42 = vld [vmem:[#allocation6 + $0x8] ss:$12 sps:$4 sm:$0xff]   ;;  %v2717_v47 = vld [vmem:[#allocation6 + $0x20] ss:$12 sps:$4 sm:$0xff]   ;;  %v2721_v48 = vld [vmem:[#allocation6 + $0xf8] ss:$12 sps:$4 sm:$0xff]  }
  0xc7   :  { %v2693_v43 = vld [vmem:[#allocation6 + $0x48] ss:$12 sps:$4 sm:$0xff]   ;;  %v2699_v50 = vld [vmem:[#allocation6 + $0x78] ss:$12 sps:$4 sm:$0xff]   ;;  %v2727_v54 = vld [vmem:[#allocation6 + $0x50] ss:$12 sps:$4 sm:$0xff]  }
  0xc8   :  { %v2722_v51 = vld [vmem:[#allocation6 + $0x38] ss:$12 sps:$4 sm:$0xff]   ;;  %v2704_v53 = vld [vmem:[#allocation6 + $0x94] ss:$12 sps:$4 sm:$0xff]   ;;  %v2702_v55 = vld [vmem:[#allocation6 + $0x90] ss:$12 sps:$4 sm:$0xff]  }
  0xc9   :  { %403 = vmatpush1.bf16.msra.mxu0 %v2650_v13  ;;  %444 = vmatpush1.bf16.msra.mxu1 %v2674_v26  ;;  %v2731_v56 = vld [vmem:[#allocation6 + $0x128] ss:$12 sps:$4 sm:$0xff]   ;;  %v2707_v57 = vld [vmem:[#allocation6 + $0xac] ss:$12 sps:$4 sm:$0xff]   ;;  %v2710_v61 = vld [vmem:[#allocation6 + $0xc4] ss:$12 sps:$4 sm:$0xff]  }
  0xca   :  { %404 = vmatprep.subr.bf16.mxu0 %v2651_v16  ;;  %445 = vmatprep.subr.bf16.mxu1 %v2675_v27  ;;  %v2732_v58 = vld [vmem:[#allocation6 + $0x68] ss:$12 sps:$4 sm:$0xff]   ;;  %v2736_v60 = vld [vmem:[#allocation6 + $0x140] ss:$12 sps:$4 sm:$0xff]   ;;  %v2713_v2 = vld [vmem:[#allocation6 + $0xd8] ss:$12 sps:$4 sm:$0xff]  }
  0xcb   :  { %v2705_v59 = vld [vmem:[#allocation6 + $0xa8] ss:$12 sps:$4 sm:$0xff]   ;;  %v2737_v62 = vld [vmem:[#allocation6 + $0x80] ss:$12 sps:$4 sm:$0xff]   ;;  %v2718_v4 = vld [vmem:[#allocation6 + $0xf0] ss:$12 sps:$4 sm:$0xff]  }
  0xcc   :  { %v2708_v63 = vld [vmem:[#allocation6 + $0xc0] ss:$12 sps:$4 sm:$0xff]   ;;  %v2715_v1 = vld [vmem:[#allocation6 + $0xdc] ss:$12 sps:$4 sm:$0xff]   ;;  %v2730_v7 = vld [vmem:[#allocation6 + $0x124] ss:$12 sps:$4 sm:$0xff]  }
  0xcd   :  { %405 = vmatpush1.bf16.msra.mxu0 %v2653_v17  ;;  %446 = vmatpush1.bf16.msra.mxu1 %v2677_v30  ;;  %v2720_v3 = vld [vmem:[#allocation6 + $0xf4] ss:$12 sps:$4 sm:$0xff]   ;;  %v2725_v5 = vld [vmem:[#allocation6 + $0x10c] ss:$12 sps:$4 sm:$0xff]   ;;  %v2735_v9 = vld [vmem:[#allocation6 + $0x13c] ss:$12 sps:$4 sm:$0xff]  }
  0xce   :  { %406 = vmatprep.subr.bf16.mxu0 %v2654_v20  ;;  %447 = vmatprep.subr.bf16.mxu1 %v2678_v31  ;;  %v2723_v6 = vld [vmem:[#allocation6 + $0x108] ss:$12 sps:$4 sm:$0xff]   ;;  %v2728_v8 = vld [vmem:[#allocation6 + $0x120] ss:$12 sps:$4 sm:$0xff]   ;;  %v2733_v10 = vld [vmem:[#allocation6 + $0x138] ss:$12 sps:$4 sm:$0xff]  }
  0xcf   :  { %v2740_v11 = vld [vmem:[#allocation6 + $0x154] ss:$12 sps:$4 sm:$0xff]   ;;  %v2741_v12 = vld [vmem:[#allocation6 + $0x158] ss:$12 sps:$4 sm:$0xff]   ;;  %v2738_v13 = vld [vmem:[#allocation6 + $0x150] ss:$12 sps:$4 sm:$0xff]  }
  0xd0   :  { %v2742_v14 = vld [vmem:[#allocation6 + $0x98] ss:$12 sps:$4 sm:$0xff]   ;;  %v2746_v16 = vld [vmem:[#allocation6 + $0x170] ss:$12 sps:$4 sm:$0xff]   ;;  %v2743_v17 = vld [vmem:[#allocation6 + $0x168] ss:$12 sps:$4 sm:$0xff]  }
  0xd1   :  { %407 = vmatpush1.bf16.msra.mxu0 %v2656_v21  ;;  %448 = vmatpush1.bf16.msra.mxu1 %v2680_v34  ;;  %v2745_v15 = vld [vmem:[#allocation6 + $0x16c] ss:$12 sps:$4 sm:$0xff]   ;;  %v2747_v18 = vld [vmem:[#allocation6 + $0xb0] ss:$12 sps:$4 sm:$0xff]   ;;  %v2751_v20 = vld [vmem:[#allocation6 + $0x248] ss:$12 sps:$4 sm:$0xff]   ;;  %v214_v21 = vlaneseq }
  0xd2   :  { %408 = vmatprep.subr.bf16.mxu0 %v2657_v24  ;;  %449 = vmatprep.subr.bf16.mxu1 %v2681_v35  ;;  %v2750_v19 = vld [vmem:[#allocation6 + $0x184] ss:$12 sps:$4 sm:$0xff]   ;;  %v3410_v24 = vld [vmem:[#allocation4] sm:$0xf] }
  0xd3   :  { %v3405_v22 = vshrl.u32 %v214_v21, 7  ;;  %v2787_v21 = vld [vmem:[#allocation6 + $0x230] ss:$12 sps:$4 sm:$0xff]  }
  0xd5   :  { %409 = vmatpush1.bf16.msra.mxu0 %v2659_v25  ;;  %450 = vmatpush1.bf16.msra.mxu1 %v2683_v38  ;;  %v3408_v23 = vsub.s32 0, %v3405_v22  ;;  %v3413_v25 = vsub.s32 1, %v3405_v22 }
  0xd6   :  { %1149 = vmatprep.subr.bf16.mxu0 %v2686_v28  ;;  %2450 = vmatprep.subr.bf16.mxu1 %v2711_v40  ;;  %v2748_v40 = vld [vmem:[#allocation6 + $0x180] ss:$12 sps:$4 sm:$0xff]  }
  0xd7   :  { %v217_v26 = vrot.slane %v3410_v24, %v3408_v23  ;;  %v221_v27 = vrot.slane %v3410_v24, %v3413_v25 }
  0xd8   :  { %427 = vmatmul.mubr.bf16.vlgmr.msra.gmra.mrb[0].mxu0 %v179_v29  ;;  %468 = vmatmul.mubr.bf16.vlgmr.msra.gmra.mrb[0].mxu1 %v179_v29 }
  0xd9   :  { %1150 = vmatpush1.bf16.msra.mxu0 %v2684_v32  ;;  %2451 = vmatpush3.bf16.msra.mxu1 %v2712_v42 }
  0xda   :  { %1151 = vmatprep.subr.bf16.mxu0 %v2689_v33  ;;  %2452 = vmatprep.subr.bf16.mxu1 %v2716_v44  ;;  %v2756_v44 = vld [vmem:[#allocation6 + $0x260] ss:$12 sps:$4 sm:$0xff]  }
  0xdd   :  { %1152 = vmatpush1.bf16.msra.mxu0 %v2687_v36  ;;  %2453 = vmatpush3.bf16.msra.mxu1 %v2717_v47  ;;  %v2757_v47 = vld [vmem:[#allocation6 + $0x1a0] ss:$12 sps:$4 sm:$0xff]  }
  0xde   :  { %1153 = vmatprep.subr.bf16.mxu0 %v2692_v37  ;;  %2454 = vmatprep.subr.bf16.mxu1 %v2721_v48  ;;  %v228_v37 = vsub.s32 3, %v3405_v22 }
  0xe1   :  { %1154 = vmatpush1.bf16.msra.mxu0 %v2690_v39  ;;  %2455 = vmatpush3.bf16.msra.mxu1 %v2722_v51 }
  0xe2   :  { %1155 = vmatprep.subr.bf16.mxu0 %v2695_v41  ;;  %2456 = vmatprep.subr.bf16.mxu1 %v2726_v52  ;;  %v2752_v41 = vld [vmem:[#allocation6 + $0x188] ss:$12 sps:$4 sm:$0xff]  }
  0xe5   :  { %1156 = vmatpush1.bf16.msra.mxu0 %v2693_v43  ;;  %2457 = vmatpush3.bf16.msra.mxu1 %v2727_v54  ;;  %v2755_v43 = vld [vmem:[#allocation6 + $0x19c] ss:$12 sps:$4 sm:$0xff]  }
  0xe6   :  { %1157 = vmatprep.subr.bf16.mxu0 %v2698_v45  ;;  %2458 = vmatprep.subr.bf16.mxu1 %v2731_v56  ;;  %v229_v45 = vrot.slane %v3410_v24, %v228_v37  ;;  %v2758_v54 = vld [vmem:[#allocation6 + $0x1b0] ss:$12 sps:$4 sm:$0xff]   ;;  %v2762_v56 = vld [vmem:[#allocation6 + $0x1b8] ss:$12 sps:$4 sm:$0xff]  }
  0xe7   :  { %v2803_v37 = vld [vmem:[#allocation6 + $0x2b8] ss:$12 sps:$4 sm:$0xff]  }
  0xe9   :  { %1158 = vmatpush1.bf16.msra.mxu0 %v2696_v46  ;;  %2459 = vmatpush3.bf16.msra.mxu1 %v2732_v58  ;;  %v2753_v46 = vld [vmem:[#allocation6 + $0x198] ss:$12 sps:$4 sm:$0xff]  }
  0xea   :  { %1159 = vmatprep.subr.bf16.mxu0 %v2701_v49  ;;  %2460 = vmatprep.subr.bf16.mxu1 %v2736_v60  ;;  %v2760_v49 = vld [vmem:[#allocation6 + $0x1b4] ss:$12 sps:$4 sm:$0xff]   ;;  %v2765_v58 = vld [vmem:[#allocation6 + $0x1cc] ss:$12 sps:$4 sm:$0xff]  }
  0xed   :  { %1160 = vmatpush1.bf16.msra.mxu0 %v2699_v50  ;;  %2461 = vmatpush3.bf16.msra.mxu1 %v2737_v62  ;;  %v2761_v50 = vld [vmem:[#allocation6 + $0x278] ss:$12 sps:$4 sm:$0xff]   ;;  %v2763_v62 = vld [vmem:[#allocation6 + $0x1c8] ss:$12 sps:$4 sm:$0xff]  }
  0xee   :  { %1161 = vmatprep.subr.bf16.mxu0 %v2704_v53  ;;  %2462 = vmatprep.subr.bf16.mxu1 %v2741_v12  ;;  %v2780_v12 = vld [vmem:[#allocation6 + $0x214] ss:$12 sps:$4 sm:$0xff]  }
  0xf1   :  { %1162 = vmatpush1.bf16.msra.mxu0 %v2702_v55  ;;  %2463 = vmatpush3.bf16.msra.mxu1 %v2742_v14 }
  0xf2   :  { %1163 = vmatprep.subr.bf16.mxu0 %v2707_v57  ;;  %2464 = vmatprep.subr.bf16.mxu1 %v2746_v16  ;;  %v2782_v16 = vld [vmem:[#allocation6 + $0x218] ss:$12 sps:$4 sm:$0xff]  }
  0xf5   :  { %1164 = vmatpush1.bf16.msra.mxu0 %v2705_v59  ;;  %2465 = vmatpush3.bf16.msra.mxu1 %v2747_v18  ;;  %v2766_v59 = vld [vmem:[#allocation6 + $0x290] ss:$12 sps:$4 sm:$0xff]  }
  0xf6   :  { %1165 = vmatprep.subr.bf16.mxu0 %v2710_v61  ;;  %2472 = vmatprep.subr.bf16.mxu1 %v2751_v20  ;;  %v2786_v18 = vld [vmem:[#allocation6 + $0x2f0] ss:$12 sps:$4 sm:$0xff]   ;;  %v2783_v20 = vld [vmem:[#allocation6 + $0x228] ss:$12 sps:$4 sm:$0xff]  }
  0xf9   :  { %1166 = vmatpush1.bf16.msra.mxu0 %v2708_v63  ;;  %v2767_v63 = vld [vmem:[#allocation6 + $0x1d0] ss:$12 sps:$4 sm:$0xff]  }
  0xfa   :  { %1167 = vmatprep.subr.bf16.mxu0 %v2715_v1  ;;  %v224_v1 = vsub.s32 2, %v3405_v22 }
  0xfd   :  { %1168 = vmatpush1.bf16.msra.mxu0 %v2713_v2  ;;  %v2770_v2 = vld [vmem:[#allocation6 + $0x1e4] ss:$12 sps:$4 sm:$0xff]  }
  0xfe   :  { %1169 = vmatprep.subr.bf16.mxu0 %v2720_v3  ;;  %v2771_v3 = vld [vmem:[#allocation6 + $0x2a8] ss:$12 sps:$4 sm:$0xff]  }
 0x101   :  { %1170 = vmatpush1.bf16.msra.mxu0 %v2718_v4  ;;  %v2768_v4 = vld [vmem:[#allocation6 + $0x1e0] ss:$12 sps:$4 sm:$0xff]  }
 0x102   :  { %1171 = vmatprep.subr.bf16.mxu0 %v2725_v5  ;;  %v2772_v5 = vld [vmem:[#allocation6 + $0x1e8] ss:$12 sps:$4 sm:$0xff]  }
 0x105   :  { %1172 = vmatpush1.bf16.msra.mxu0 %v2723_v6  ;;  %v225_v6 = vrot.slane %v3410_v24, %v224_v1  ;;  %v2790_v24 = vld [vmem:[#allocation6 + $0x244] ss:$12 sps:$4 sm:$0xff]  }
 0x106   :  { %1173 = vmatprep.subr.bf16.mxu0 %v2730_v7  ;;  %v2775_v7 = vld [vmem:[#allocation6 + $0x1fc] ss:$12 sps:$4 sm:$0xff]  }
 0x109   :  { %1174 = vmatpush1.bf16.msra.mxu0 %v2728_v8  ;;  %v2776_v8 = vld [vmem:[#allocation6 + $0x2c0] ss:$12 sps:$4 sm:$0xff]  }
 0x10a   :  { %1175 = vmatprep.subr.bf16.mxu0 %v2735_v9  ;;  %v2773_v9 = vld [vmem:[#allocation6 + $0x1f8] ss:$12 sps:$4 sm:$0xff]  }
 0x10d   :  { %1176 = vmatpush1.bf16.msra.mxu0 %v2733_v10  ;;  %v2777_v10 = vld [vmem:[#allocation6 + $0x200] ss:$12 sps:$4 sm:$0xff]  }
 0x10e   :  { %1177 = vmatprep.subr.bf16.mxu0 %v2740_v11 }
 0x111   :  { %1178 = vmatpush1.bf16.msra.mxu0 %v2738_v13  ;;  %v2781_v13 = vld [vmem:[#allocation6 + $0x2d8] ss:$12 sps:$4 sm:$0xff]  }
 0x112   :  { %1179 = vmatprep.subr.bf16.mxu0 %v2745_v15  ;;  %v2778_v15 = vld [vmem:[#allocation6 + $0x210] ss:$12 sps:$4 sm:$0xff]  }
 0x115   :  { %1180 = vmatpush1.bf16.msra.mxu0 %v2743_v17  ;;  %v2785_v17 = vld [vmem:[#allocation6 + $0x22c] ss:$12 sps:$4 sm:$0xff]  }
 0x116   :  { %1190 = vmatprep.subr.bf16.mxu0 %v2750_v19 }
 0x1ab   :  { %v428_v28 = vpop.f32.mrb[0].mxu0  ;;  %v469_v48 = vpop.f32.mrb[0].mxu1 }
 0x1ac   :  { %v429_v29 = vadd.f32 %v428_v28, %v217_v26  ;;  %v430_v30 = vpop.f32.mrb[1].mxu0  ;;  %v471_v51 = vpop.f32.mrb[1].mxu1  ;;  %v470_v11 = vadd.f32 %v469_v48, %v225_v6  ;;  %v2793_v28 = vld [vmem:[#allocation6 + $0x25c] ss:$12 sps:$4 sm:$0xff]  }
 0x1ad   :  { %v431_v31 = vadd.f32 %v430_v30, %v221_v27  ;;  %v432_v32 = vpop.f32.mrb[2].mxu0  ;;  %v472_v52 = vadd.f32 %v471_v51, %v229_v45  ;;  %v473_v53 = vpop.f32.mrb[2].mxu1  ;;  %v2788_v27 = vld [vmem:[#allocation6 + $0x240] ss:$12 sps:$4 sm:$0xff]   ;;  %v2815_v45 = vld [vmem:[#allocation7 + $0x10] ss:$8 sps:$4 sm:$0xff]  }
 0x1ae   :  { %vm476_vm0 = vcmp.ge.f32.partialorder %v429_v29, 0.0  ;;  %v480_v33 = vmul.f32 0.22916667, %v429_v29  ;;  %v433_v34 = vpop.f32.mrb[3].mxu0  ;;  %v474_v55 = vpop.f32.mrb[3].mxu1  ;;  %vm478_vm3 = vcmp.ge.f32.partialorder %v470_v11, 0.0 }
 0x1af   :  { %vm477_vm1 = vcmp.ge.f32.partialorder %v431_v31, 0.0  ;;  %v481_v35 = vmul.f32 0.22916667, %v431_v31  ;;  %vm479_vm2 = vcmp.ge.f32.partialorder %v472_v52, 0.0  ;;  %v483_v57 = vmul.f32 0.22916667, %v472_v52 }
 0x1b0   :  { %v484_v36 = vsel %vm476_vm0, %v429_v29, %v480_v33  ;;  %v482_v14 = vmul.f32 0.22916667, %v470_v11  ;;  %v2791_v29 = vld [vmem:[#allocation6 + $0x258] ss:$12 sps:$4 sm:$0xff]   ;;  %v2796_v30 = vld [vmem:[#allocation6 + $0x274] ss:$12 sps:$4 sm:$0xff]  }
 0x1b1   :  { %v485_v38 = vsel %vm477_vm1, %v431_v31, %v481_v35  ;;  %v488_v42 = vpack.c.bf16 %v484_v36, %v484_v36  ;;  %v487_v60 = vsel %vm479_vm2, %v472_v52, %v483_v57  ;;  %v2794_v31 = vld [vmem:[#allocation6 + $0x270] ss:$12 sps:$4 sm:$0xff]   ;;  %v2799_v32 = vld [vmem:[#allocation6 + $0x28c] ss:$12 sps:$4 sm:$0xff]   ;;  %v2797_v33 = vld [vmem:[#allocation6 + $0x288] ss:$12 sps:$4 sm:$0xff]  }
 0x1b2   :  { %v489_v39 = vpack.c.bf16 %v485_v38, %v485_v38  ;;  %v491_v61 = vpack.c.bf16 %v487_v60, %v487_v60  ;;  %v486_v19 = vsel %vm478_vm3, %v470_v11, %v482_v14  ;;  %v2802_v34 = vld [vmem:[#allocation6 + $0x2a4] ss:$12 sps:$4 sm:$0xff]   ;;  %v2800_v35 = vld [vmem:[#allocation6 + $0x2a0] ss:$12 sps:$4 sm:$0xff]   ;;  %v2805_v36 = vld [vmem:[#allocation6 + $0x2bc] ss:$12 sps:$4 sm:$0xff]  }
 0x1b3   :  { %v490_v26 = vpack.c.bf16 %v486_v19, %v486_v19  ;;  %v2808_v38 = vld [vmem:[#allocation6 + $0x2d4] ss:$12 sps:$4 sm:$0xff]   ;;  %v2827_v53 = vld [vmem:[#allocation7 + $0x50] ss:$8 sps:$4 sm:$0xff]  }
 0x1b4   :  { %1181 = vmatprep.mubr.bf16.mxu0 %v489_v39  ;;  %1263 = vmatprep.mubr.bf16.mxu1 %v489_v39  ;;  %v2806_v39 = vld [vmem:[#allocation6 + $0x2d0] ss:$12 sps:$4 sm:$0xff]   ;;  %v2824_v51 = vld [vmem:[#allocation7 + $0x40] ss:$8 sps:$4 sm:$0xff]  }
 0x1b5   :  { %1182 = vmatmul.mubr.bf16.vlgmr.msra.gmra.mrb[4].mxu0 %v488_v42  ;;  %1264 = vmatmul.mubr.bf16.vlgmr.msra.gmra.mrb[4].mxu1 %v488_v42  ;;  %v2812_v42 = vld [vmem:[#allocation7] ss:$8 sps:$4 sm:$0xff]   ;;  %v2823_v48 = vld [vmem:[#allocation7 + $0x34] ss:$8 sps:$4 sm:$0xff]   ;;  %v2833_v57 = vld [vmem:[#allocation7 + $0x70] ss:$8 sps:$4 sm:$0xff]  }
 0x1b6   :  { %1191 = vmatpush1.bf16.msra.mxu0 %v2748_v40  ;;  %2473 = vmatpush3.bf16.msra.mxu1 %v2752_v41  ;;  %v2811_v40 = vld [vmem:[#allocation6 + $0x2ec] ss:$12 sps:$4 sm:$0xff]   ;;  %v2809_v41 = vld [vmem:[#allocation6 + $0x2e8] ss:$12 sps:$4 sm:$0xff]  }
 0x1b7   :  { %1192 = vmatprep.subr.bf16.mxu0 %v2755_v43  ;;  %2474 = vmatprep.subr.bf16.mxu1 %v2756_v44  ;;  %v2814_v43 = vld [vmem:[#allocation7 + $0x4] ss:$8 sps:$4 sm:$0xff]   ;;  %v2817_v44 = vld [vmem:[#allocation7 + $0x14] ss:$8 sps:$4 sm:$0xff]   ;;  %v2830_v55 = vld [vmem:[#allocation7 + $0x60] ss:$8 sps:$4 sm:$0xff]  }
 0x1b8   :  { %1303 = vmatprep.mubr.bf16.mxu1 %v491_v61  ;;  %1222 = vmatprep.mubr.bf16.mxu0 %v491_v61  ;;  %v2829_v52 = vld [vmem:[#allocation7 + $0x54] ss:$8 sps:$4 sm:$0xff]   ;;  %v2839_v61 = vld [vmem:[#allocation7 + $0x90] ss:$8 sps:$4 sm:$0xff]   ;;  %v2885_v14 = vld [vmem:[#allocation10] sm:$0xff]  }
 0x1b9   :  { %v2841_v60 = vld [vmem:[#allocation7 + $0x94] ss:$8 sps:$4 sm:$0xff]   ;;  %v2857_v11 = vld [vmem:[#allocation7 + $0xf0] ss:$8 sps:$4 sm:$0xff]  }
 0x1ba   :  { %1193 = vmatpush1.bf16.msra.mxu0 %v2753_v46  ;;  %2475 = vmatpush3.bf16.msra.mxu1 %v2757_v47  ;;  %v2820_v46 = vld [vmem:[#allocation7 + $0x24] ss:$8 sps:$4 sm:$0xff]   ;;  %v2818_v47 = vld [vmem:[#allocation7 + $0x20] ss:$8 sps:$4 sm:$0xff]   ;;  %v2853_v6 = vld [vmem:[#allocation7 + $0xd4] ss:$8 sps:$4 sm:$0xff]  }
 0x1bb   :  { %1194 = vmatprep.subr.bf16.mxu0 %v2760_v49  ;;  %2476 = vmatprep.subr.bf16.mxu1 %v2761_v50  ;;  %v2821_v49 = vld [vmem:[#allocation7 + $0x30] ss:$8 sps:$4 sm:$0xff]   ;;  %v2826_v50 = vld [vmem:[#allocation7 + $0x44] ss:$8 sps:$4 sm:$0xff]  }
 0x1bc   :  { %v2890_v19 = vld [vmem:[#allocation10 + $0x58] sm:$0xff]  }
 0x1be   :  { %1195 = vmatpush1.bf16.msra.mxu0 %v2758_v54  ;;  %2477 = vmatpush3.bf16.msra.mxu1 %v2762_v56  ;;  %v2832_v54 = vld [vmem:[#allocation7 + $0x64] ss:$8 sps:$4 sm:$0xff]   ;;  %v2835_v56 = vld [vmem:[#allocation7 + $0x74] ss:$8 sps:$4 sm:$0xff]  }
 0x1bf   :  { %1196 = vmatprep.subr.bf16.mxu0 %v2765_v58  ;;  %2478 = vmatprep.subr.bf16.mxu1 %v2766_v59  ;;  %v2838_v58 = vld [vmem:[#allocation7 + $0x84] ss:$8 sps:$4 sm:$0xff]   ;;  %v2836_v59 = vld [vmem:[#allocation7 + $0x80] ss:$8 sps:$4 sm:$0xff]  }
 0x1c2   :  { %1197 = vmatpush1.bf16.msra.mxu0 %v2763_v62  ;;  %2479 = vmatpush3.bf16.msra.mxu1 %v2767_v63  ;;  %v2844_v62 = vld [vmem:[#allocation7 + $0xa4] ss:$8 sps:$4 sm:$0xff]   ;;  %v2842_v63 = vld [vmem:[#allocation7 + $0xa0] ss:$8 sps:$4 sm:$0xff]  }
 0x1c3   :  { %1198 = vmatprep.subr.bf16.mxu0 %v2770_v2  ;;  %2480 = vmatprep.subr.bf16.mxu1 %v2771_v3  ;;  %v2847_v2 = vld [vmem:[#allocation7 + $0xb4] ss:$8 sps:$4 sm:$0xff]   ;;  %v2845_v3 = vld [vmem:[#allocation7 + $0xb0] ss:$8 sps:$4 sm:$0xff]  }
 0x1c6   :  { %1199 = vmatpush1.bf16.msra.mxu0 %v2768_v4  ;;  %2481 = vmatpush3.bf16.msra.mxu1 %v2772_v5  ;;  %v2850_v4 = vld [vmem:[#allocation7 + $0xc4] ss:$8 sps:$4 sm:$0xff]   ;;  %v2848_v5 = vld [vmem:[#allocation7 + $0xc0] ss:$8 sps:$4 sm:$0xff]  }
 0x1c7   :  { %1200 = vmatprep.subr.bf16.mxu0 %v2775_v7  ;;  %2482 = vmatprep.subr.bf16.mxu1 %v2776_v8  ;;  %v2851_v7 = vld [vmem:[#allocation7 + $0xd0] ss:$8 sps:$4 sm:$0xff]   ;;  %v2856_v8 = vld [vmem:[#allocation7 + $0xe4] ss:$8 sps:$4 sm:$0xff]  }
 0x1ca   :  { %1201 = vmatpush1.bf16.msra.mxu0 %v2773_v9  ;;  %2483 = vmatpush3.bf16.msra.mxu1 %v2777_v10  ;;  %v2854_v9 = vld [vmem:[#allocation7 + $0xe0] ss:$8 sps:$4 sm:$0xff]   ;;  %v2859_v10 = vld [vmem:[#allocation7 + $0xf4] ss:$8 sps:$4 sm:$0xff]  }
 0x1cb   :  { %1202 = vmatprep.subr.bf16.mxu0 %v2780_v12  ;;  %2484 = vmatprep.subr.bf16.mxu1 %v2781_v13  ;;  %v2862_v12 = vld [vmem:[#allocation7 + $0x104] ss:$8 sps:$4 sm:$0xff]  }
 0x1cc   :  { %v2884_v13 = vld [vmem:[#allocation10 + $0x40] sm:$0xff]  }
 0x1ce   :  { %1203 = vmatpush1.bf16.msra.mxu0 %v2778_v15  ;;  %2485 = vmatpush3.bf16.msra.mxu1 %v2782_v16  ;;  %v2886_v15 = vld [vmem:[#allocation10 + $0x48] sm:$0xff]  }
 0x1cf   :  { %1204 = vmatprep.subr.bf16.mxu0 %v2785_v17  ;;  %2486 = vmatprep.subr.bf16.mxu1 %v2786_v18  ;;  %v2887_v16 = vld [vmem:[#allocation10 + $0x8] sm:$0xff]   ;;  %v2888_v17 = vld [vmem:[#allocation10 + $0x50] sm:$0xff]  }
 0x1d0   :  { %v2889_v18 = vld [vmem:[#allocation10 + $0x10] sm:$0xff]  }
 0x1d2   :  { %1205 = vmatpush1.bf16.msra.mxu0 %v2783_v20  ;;  %2487 = vmatpush3.bf16.msra.mxu1 %v2787_v21  ;;  %v2891_v20 = vld [vmem:[#allocation10 + $0x18] sm:$0xff]   ;;  %v2892_v21 = vld [vmem:[#allocation10 + $0x60] sm:$0xff]  }
 0x1d3   :  { %1206 = vmatprep.subr.bf16.mxu0 %v2790_v24  ;;  %1617 = vmatprep.subr.bf16.mxu1 %v2814_v43  ;;  %v2893_v24 = vld [vmem:[#allocation10 + $0x20] sm:$0xff]  }
 0x1d5   :  { %1304 = vmatmul.mubr.bf16.vlgmr.msra.gmra.mrb[8].mxu1 %v490_v26 }
 0x1d6   :  { %1207 = vmatpush1.bf16.msra.mxu0 %v2788_v27  ;;  %1618 = vmatpush1.bf16.msra.mxu1 %v2812_v42  ;;  %v2895_v27 = vld [vmem:[#allocation10 + $0x28] sm:$0xff]  }
 0x1d7   :  { %1208 = vmatprep.subr.bf16.mxu0 %v2793_v28  ;;  %1619 = vmatprep.subr.bf16.mxu1 %v2817_v44 }
 0x1da   :  { %1209 = vmatpush1.bf16.msra.mxu0 %v2791_v29  ;;  %1620 = vmatpush1.bf16.msra.mxu1 %v2815_v45 }
 0x1db   :  { %1210 = vmatprep.subr.bf16.mxu0 %v2796_v30  ;;  %1621 = vmatprep.subr.bf16.mxu1 %v2820_v46 }
 0x1de   :  { %1211 = vmatpush1.bf16.msra.mxu0 %v2794_v31  ;;  %1622 = vmatpush1.bf16.msra.mxu1 %v2818_v47 }
 0x1df   :  { %1212 = vmatprep.subr.bf16.mxu0 %v2799_v32  ;;  %1623 = vmatprep.subr.bf16.mxu1 %v2823_v48 }
 0x1e2   :  { %1213 = vmatpush1.bf16.msra.mxu0 %v2797_v33  ;;  %1624 = vmatpush1.bf16.msra.mxu1 %v2821_v49  ;;  %v620_v33 = vld [vmem:[%s3502_s4] sm:$0x7] }
 0x1e3   :  { %1214 = vmatprep.subr.bf16.mxu0 %v2802_v34  ;;  %1625 = vmatprep.subr.bf16.mxu1 %v2826_v50  ;;  %v633_v34 = vrot.slane %v620_v33, %v224_v1  ;;  %v625_v42 = vrot.slane %v620_v33, %v3408_v23  ;;  %v629_v43 = vrot.slane %v620_v33, %v3413_v25  ;;  %v2908_v33 = vld [vmem:[%s3509_s11] sm:$0xff]  }
 0x1e6   :  { %1215 = vmatpush1.bf16.msra.mxu0 %v2800_v35  ;;  %1626 = vmatpush1.bf16.msra.mxu1 %v2824_v51  ;;  %v2860_v51 = vld [vmem:[#allocation7 + $0x100] ss:$8 sps:$4 sm:$0xff]  }
 0x1e7   :  { %1216 = vmatprep.subr.bf16.mxu0 %v2805_v36  ;;  %1627 = vmatprep.subr.bf16.mxu1 %v2829_v52 }
 0x1ea   :  { %1217 = vmatpush1.bf16.msra.mxu0 %v2803_v37  ;;  %1628 = vmatpush1.bf16.msra.mxu1 %v2827_v53  ;;  %v2865_v53 = vld [vmem:[#allocation7 + $0x114] ss:$8 sps:$4 sm:$0xff]  }
 0x1eb   :  { %1218 = vmatprep.subr.bf16.mxu0 %v2808_v38  ;;  %1629 = vmatprep.subr.bf16.mxu1 %v2832_v54  ;;  %v2863_v54 = vld [vmem:[#allocation7 + $0x110] ss:$8 sps:$4 sm:$0xff]  }
 0x1ee   :  { %1219 = vmatpush1.bf16.msra.mxu0 %v2806_v39  ;;  %1630 = vmatpush1.bf16.msra.mxu1 %v2830_v55  ;;  %v2868_v55 = vld [vmem:[#allocation7 + $0x124] ss:$8 sps:$4 sm:$0xff]  }
 0x1ef   :  { %1220 = vmatprep.subr.bf16.mxu0 %v2811_v40  ;;  %1631 = vmatprep.subr.bf16.mxu1 %v2835_v56  ;;  %v2866_v56 = vld [vmem:[#allocation7 + $0x120] ss:$8 sps:$4 sm:$0xff]  }
 0x1f2   :  { %1221 = vmatpush1.bf16.msra.mxu0 %v2809_v41  ;;  %1632 = vmatpush1.bf16.msra.mxu1 %v2833_v57  ;;  %v2871_v57 = vld [vmem:[#allocation7 + $0x134] ss:$8 sps:$4 sm:$0xff]  }
 0x1f3   :  { %1633 = vmatprep.subr.bf16.mxu1 %v2838_v58  ;;  %2494 = vmatprep.subr.bf16.mxu0 %v2884_v13  ;;  %v2869_v58 = vld [vmem:[#allocation7 + $0x130] ss:$8 sps:$4 sm:$0xff]  }
 0x1f5   :  { %1223 = vmatmul.mubr.bf16.vlgmr.msra.gmra.mrb[4].mxu0 %v490_v26  ;;  %v2894_v26 = vld [vmem:[#allocation10 + $0x68] sm:$0xff]  }
 0x1f6   :  { %1634 = vmatpush1.bf16.msra.mxu1 %v2836_v59  ;;  %2495 = vmatpush3.bf16.msra.mxu0 %v2885_v14  ;;  %v2874_v59 = vld [vmem:[#allocation7 + $0x144] ss:$8 sps:$4 sm:$0xff]  }
 0x1f7   :  { %1635 = vmatprep.subr.bf16.mxu1 %v2841_v60  ;;  %2496 = vmatprep.subr.bf16.mxu0 %v2886_v15  ;;  %v2872_v60 = vld [vmem:[#allocation7 + $0x140] ss:$8 sps:$4 sm:$0xff]  }
 0x1fa   :  { %1636 = vmatpush1.bf16.msra.mxu1 %v2839_v61  ;;  %2497 = vmatpush3.bf16.msra.mxu0 %v2887_v16  ;;  %v2877_v61 = vld [vmem:[#allocation7 + $0x154] ss:$8 sps:$4 sm:$0xff]  }
 0x1fb   :  { %1637 = vmatprep.subr.bf16.mxu1 %v2844_v62  ;;  %2498 = vmatprep.subr.bf16.mxu0 %v2888_v17  ;;  %v2875_v62 = vld [vmem:[#allocation7 + $0x150] ss:$8 sps:$4 sm:$0xff]  }
 0x1fe   :  { %1638 = vmatpush1.bf16.msra.mxu1 %v2842_v63  ;;  %2499 = vmatpush3.bf16.msra.mxu0 %v2889_v18  ;;  %v2880_v63 = vld [vmem:[#allocation7 + $0x164] ss:$8 sps:$4 sm:$0xff]  }
 0x1ff   :  { %1639 = vmatprep.subr.bf16.mxu1 %v2847_v2  ;;  %2500 = vmatprep.subr.bf16.mxu0 %v2890_v19  ;;  %v2883_v2 = vld [vmem:[#allocation7 + $0x174] ss:$8 sps:$4 sm:$0xff]  }
 0x202   :  { %1640 = vmatpush1.bf16.msra.mxu1 %v2845_v3  ;;  %2501 = vmatpush3.bf16.msra.mxu0 %v2891_v20  ;;  %v2881_v3 = vld [vmem:[#allocation7 + $0x170] ss:$8 sps:$4 sm:$0xff]  }
 0x203   :  { %1641 = vmatprep.subr.bf16.mxu1 %v2850_v4  ;;  %2502 = vmatprep.subr.bf16.mxu0 %v2892_v21 }
 0x206   :  { %1642 = vmatpush1.bf16.msra.mxu1 %v2848_v5  ;;  %2503 = vmatpush3.bf16.msra.mxu0 %v2893_v24 }
 0x207   :  { %1643 = vmatprep.subr.bf16.mxu1 %v2853_v6  ;;  %2504 = vmatprep.subr.bf16.mxu0 %v2894_v26  ;;  %v2896_v6 = vld [vmem:[#allocation10 + $0x70] sm:$0xff]   ;;  %v2900_v26 = vld [vmem:[#allocation13] sm:$0xff]  }
 0x20a   :  { %1644 = vmatpush1.bf16.msra.mxu1 %v2851_v7  ;;  %2505 = vmatpush3.bf16.msra.mxu0 %v2895_v27  ;;  %v2897_v7 = vld [vmem:[#allocation10 + $0x30] sm:$0xff]  }
 0x20b   :  { %1645 = vmatprep.subr.bf16.mxu1 %v2856_v8  ;;  %2506 = vmatprep.subr.bf16.mxu0 %v2896_v6  ;;  %v2898_v8 = vld [vmem:[#allocation10 + $0x78] sm:$0xff]  }
 0x20e   :  { %1646 = vmatpush1.bf16.msra.mxu1 %v2854_v9  ;;  %2507 = vmatpush3.bf16.msra.mxu0 %v2897_v7  ;;  %v2899_v9 = vld [vmem:[#allocation10 + $0x38] sm:$0xff]  }
 0x20f   :  { %1647 = vmatprep.subr.bf16.mxu1 %v2859_v10  ;;  %2508 = vmatprep.subr.bf16.mxu0 %v2898_v8  ;;  %v3175_v10 = vmov 0.0  }
 0x212   :  { %1648 = vmatpush1.bf16.msra.mxu1 %v2857_v11  ;;  %2509 = vmatpush3.bf16.msra.mxu0 %v2899_v9  ;;  %v1365_v11 = vld [vmem:[#allocation9] sm:$0x3] }
 0x213   :  { %1658 = vmatprep.subr.bf16.mxu1 %v2862_v12  ;;  %2543 = vmatprep.subr.bf16.mxu0 %v3175_v10  ;;  %v1370_v12 = vrot.slane %v1365_v11, %v3408_v23  ;;  %v1374_v13 = vrot.slane %v1365_v11, %v3413_v25  ;;  %v2902_v23 = vld [vmem:[#allocation13 + $0x10] sm:$0xff]   ;;  %v2903_v25 = vld [vmem:[#allocation13 + $0x18] sm:$0xff]  }
 0x288   :  { %v2466_v28 = vpop.f32.mrb[4].mxu1 }
 0x289   :  { %v2467_v29 = vpop.f32.mrb[5].mxu1 }
 0x28a   :  { %v2468_v30 = vadd.f32 %v2467_v29, %v2466_v28  ;;  %v2469_v31 = vpop.f32.mrb[6].mxu1  ;;  %v2901_v28 = vld [vmem:[#allocation13 + $0x8] sm:$0xff]   ;;  %v2904_v29 = vld [vmem:[#allocation13 + $0x20] sm:$0xff]  }
 0x28b   :  { %v2470_v32 = vpop.f32.mrb[7].mxu1  ;;  %v2906_v31 = vld [vmem:[#allocation13 + $0x30] sm:$0xff]  }
 0x28c   :  { %v1266_v37 = vadd.f32 %v2468_v30, %v633_v34  ;;  %v2905_v30 = vld [vmem:[#allocation13 + $0x28] sm:$0xff]   ;;  %v2907_v32 = vld [vmem:[#allocation13 + $0x38] sm:$0xff]   ;;  %v2909_v34 = vld [vmem:[%s3509_s11 + $0x8] sm:$0xff]  }
 0x2a8   :  { %v2488_v35 = vpop.f32.mrb[8].mxu1 }
 0x2a9   :  { %v2489_v36 = vpop.f32.mrb[9].mxu1 }
 0x2aa   :  { %v2490_v38 = vadd.f32 %v2489_v36, %v2488_v35  ;;  %v2491_v39 = vpop.f32.mrb[10].mxu1  ;;  %v2910_v35 = vld [vmem:[%s3509_s11 + $0x10] sm:$0xff]   ;;  %v2911_v36 = vld [vmem:[%s3509_s11 + $0x18] sm:$0xff]  }
 0x2ab   :  { %v2492_v40 = vpop.f32.mrb[11].mxu1 }
 0x2ac   :  { %v1306_v41 = vadd.f32 %v2490_v38, %v1266_v37  ;;  %v2912_v37 = vld [vmem:[%s3509_s11 + $0x20] sm:$0xff]   ;;  %v2913_v38 = vld [vmem:[%s3509_s11 + $0x28] sm:$0xff]  }
 0x2ad   :  { %v2406_v40 = vld [vmem:[#allocation12] ss:$0 sm:$0xff] }
 0x2ae   :  { %v1313_v4 = vmax.f32 %v1306_v41, 0.0 }
 0x2b0   :  { %v1316_v5 = vpack.c.bf16 %v1313_v4, %v1313_v4 }
 0x2c8   :  { %v1224_v44 = vpop.f32.mrb[4].mxu0 }
 0x2c9   :  { %v2603_v45 = vadd.f32 %v1224_v44, %v625_v42  ;;  %v1226_v46 = vpop.f32.mrb[5].mxu0 }
 0x2ca   :  { %v2604_v47 = vadd.f32 %v1226_v46, %v629_v43  ;;  %v1228_v48 = vpop.f32.mrb[6].mxu0 }
 0x2cb   :  { %v1311_v49 = vmax.f32 %v2603_v45, 0.0  ;;  %v1229_v50 = vpop.f32.mrb[7].mxu0  ;;  %v2914_v48 = vld [vmem:[%s3509_s11 + $0x30] sm:$0xff]  }
 0x2cc   :  { %v1312_v22 = vmax.f32 %v2604_v47, 0.0  ;;  %v2916_v50 = vld [vmem:[#allocation16] sm:$0xff]  }
 0x2cd   :  { %v1314_v52 = vpack.c.bf16 %v1311_v49, %v1311_v49  ;;  %v2915_v49 = vld [vmem:[%s3509_s11 + $0x38] sm:$0xff]  }
 0x2ce   :  { %v1315_v1 = vpack.c.bf16 %v1312_v22, %v1312_v22  ;;  %v2917_v22 = vld [vmem:[#allocation16 + $0x8] sm:$0xff]  }
 0x2d0   :  { %1649 = vmatprep.mubr.bf16.mxu1 %v1315_v1  ;;  %v2918_v1 = vld [vmem:[#allocation16 + $0x10] sm:$0xff]  }
 0x2d1   :  { %1650 = vmatmul.mubr.bf16.vlgmr.msra.gmra.mrb[12].mxu1 %v1314_v52  ;;  %v2920_v52 = vld [vmem:[#allocation16 + $0x20] sm:$0xff]  }
 0x2d2   :  { %1659 = vmatpush1.bf16.msra.mxu1 %v2860_v51  ;;  %1690 = vmatprep.mubr.bf16.mxu1 %v3174_v0  ;;  %v2878_v0 = vld [vmem:[#allocation7 + $0x160] ss:$8 sps:$4 sm:$0xff]  }
 0x2d3   :  { %1660 = vmatprep.subr.bf16.mxu1 %v2865_v53  ;;  %v2919_v51 = vld [vmem:[#allocation16 + $0x18] sm:$0xff]   ;;  %v2921_v53 = vld [vmem:[#allocation16 + $0x28] sm:$0xff]  }
 0x2d6   :  { %1661 = vmatpush1.bf16.msra.mxu1 %v2863_v54  ;;  %v2423_v54 = vld [vmem:[#allocation15] ss:$0 sm:$0xff] }
 0x2d7   :  { %1662 = vmatprep.subr.bf16.mxu1 %v2868_v55 }
 0x2da   :  { %1663 = vmatpush1.bf16.msra.mxu1 %v2866_v56 }
 0x2db   :  { %1664 = vmatprep.subr.bf16.mxu1 %v2871_v57 }
 0x2de   :  { %1665 = vmatpush1.bf16.msra.mxu1 %v2869_v58 }
 0x2df   :  { %1666 = vmatprep.subr.bf16.mxu1 %v2874_v59 }
 0x2e2   :  { %1667 = vmatpush1.bf16.msra.mxu1 %v2872_v60 }
 0x2e3   :  { %1668 = vmatprep.subr.bf16.mxu1 %v2877_v61 }
 0x2e6   :  { %1669 = vmatpush1.bf16.msra.mxu1 %v2875_v62  ;;  %v2922_v62 = vld [vmem:[#allocation16 + $0x30] sm:$0xff]  }
 0x2e7   :  { %1670 = vmatprep.subr.bf16.mxu1 %v2880_v63  ;;  %v2923_v63 = vld [vmem:[#allocation16 + $0x38] sm:$0xff]  }
 0x2ea   :  { %1671 = vmatpush1.bf16.msra.mxu1 %v2878_v0  ;;  %v2432_v0 = vld [vmem:[%s3510_s12] ss:$0 sm:$0xff] }
 0x2eb   :  { %1672 = vmatprep.subr.bf16.mxu1 %v2883_v2 }
 0x2ee   :  { %1673 = vmatpush1.bf16.msra.mxu1 %v2881_v3 }
 0x2ef   :  { %2563 = vmatprep.subr.bf16.mxu1 %v3175_v10 }
 0x2f1   :  { %1691 = vmatmul.mubr.bf16.vlgmr.msra.gmra.mrb[12].mxu1 %v1316_v5 }
 0x2f2   :  { %2579 = vmatprep.mubr.msk.bf16.mxu1 %vm3176_vm4, %v3175_v10  ;;  %2564 = vmatpush3.bf16.msra.mxu1 %v2908_v33 }
 0x2f3   :  { %2565 = vmatprep.subr.bf16.mxu1 %v3175_v10 }
 0x2f6   :  { %2566 = vmatpush3.bf16.msra.mxu1 %v2909_v34 }
 0x2f7   :  { %2567 = vmatprep.subr.bf16.mxu1 %v3175_v10 }
 0x2fa   :  { %2568 = vmatpush3.bf16.msra.mxu1 %v2910_v35 }
 0x2fb   :  { %2569 = vmatprep.subr.bf16.mxu1 %v3175_v10 }
 0x2fe   :  { %2570 = vmatpush3.bf16.msra.mxu1 %v2911_v36 }
 0x2ff   :  { %2571 = vmatprep.subr.bf16.mxu1 %v3175_v10 }
 0x302   :  { %2572 = vmatpush3.bf16.msra.mxu1 %v2912_v37 }
 0x303   :  { %2573 = vmatprep.subr.bf16.mxu1 %v3175_v10 }
 0x306   :  { %2574 = vmatpush3.bf16.msra.mxu1 %v2913_v38 }
 0x307   :  { %2575 = vmatprep.subr.bf16.mxu1 %v3175_v10 }
 0x30a   :  { %2576 = vmatpush3.bf16.msra.mxu1 %v2914_v48 }
 0x30b   :  { %2577 = vmatprep.subr.bf16.mxu1 %v3175_v10 }
 0x30e   :  { %2578 = vmatpush3.bf16.msra.mxu1 %v2915_v49 }
 0x3c4   :  { %v1692_v14 = vpop.f32.mrb[12].mxu1 }
 0x3c5   :  { %v2605_v15 = vadd.f32 %v1692_v14, %v1370_v12  ;;  %v1694_v16 = vpop.f32.mrb[13].mxu1 }
 0x3c6   :  { %v2606_v17 = vadd.f32 %v1694_v16, %v1374_v13  ;;  %v1696_v18 = vpop.f32.mrb[14].mxu1 }
 0x3c7   :  { %v1699_v19 = vmax.f32 %v2605_v15, 0.0  ;;  %v1697_v20 = vpop.f32.mrb[15].mxu1 }
 0x3c8   :  { %v1700_v21 = vmax.f32 %v2606_v17, 0.0 }
 0x3c9   :  { %v1701_v27 = vpack.c.bf16 %v1699_v19, %v1699_v19 }
 0x3ca   :  { %v1702_v24 = vpack.c.bf16 %v1700_v21, %v1700_v21 }
 0x3cc   :  { %1870 = vmatprep.mubr.bf16.mxu0 %v1702_v24 }
 0x3cd   :  { %1871 = vmatmul.mubr.bf16.vlgmr.msra.gmra.mrb[8].mxu0 %v1701_v27 }
 0x3ce   :  { %2544 = vmatpush3.bf16.msra.mxu0 %v2900_v26  ;;  %2559 = vmatprep.mubr.msk.bf16.mxu0 %vm3176_vm4, %v3175_v10 }
 0x3cf   :  { %2545 = vmatprep.subr.bf16.mxu0 %v3175_v10 }
 0x3d2   :  { %2546 = vmatpush3.bf16.msra.mxu0 %v2901_v28 }
 0x3d3   :  { %2547 = vmatprep.subr.bf16.mxu0 %v3175_v10 }
 0x3d6   :  { %2548 = vmatpush3.bf16.msra.mxu0 %v2902_v23 }
 0x3d7   :  { %2549 = vmatprep.subr.bf16.mxu0 %v3175_v10 }
 0x3da   :  { %2550 = vmatpush3.bf16.msra.mxu0 %v2903_v25 }
 0x3db   :  { %2551 = vmatprep.subr.bf16.mxu0 %v3175_v10 }
 0x3de   :  { %2552 = vmatpush3.bf16.msra.mxu0 %v2904_v29 }
 0x3df   :  { %2553 = vmatprep.subr.bf16.mxu0 %v3175_v10 }
 0x3e2   :  { %2554 = vmatpush3.bf16.msra.mxu0 %v2905_v30 }
 0x3e3   :  { %2555 = vmatprep.subr.bf16.mxu0 %v3175_v10 }
 0x3e6   :  { %2556 = vmatpush3.bf16.msra.mxu0 %v2906_v31 }
 0x3e7   :  { %2557 = vmatprep.subr.bf16.mxu0 %v3175_v10 }
 0x3ea   :  { %2558 = vmatpush3.bf16.msra.mxu0 %v2907_v32 }
 0x3eb   :  { %2583 = vmatprep.subr.bf16.mxu0 %v3175_v10 }
 0x4a0   :  { %v2510_v39 = vpop.f32.mrb[8].mxu0 }
 0x4a1   :  { %v2511_v41 = vpop.f32.mrb[9].mxu0 }
 0x4a2   :  { %v2512_v42 = vadd.f32 %v2511_v41, %v2510_v39  ;;  %v2513_v43 = vpop.f32.mrb[10].mxu0 }
 0x4a3   :  { %v2514_v44 = vpop.f32.mrb[11].mxu0 }
 0x4a4   :  { %v1873_v45 = vadd.f32 %v2512_v42, %v2406_v40 }
 0x4a6   :  { %v1878_v46 = vmax.f32 %v1873_v45, 0.0 }
 0x4a8   :  { %v1879_v47 = vpack.c.bf16 %v1878_v46, %v1878_v46 }
 0x4aa   :  { %2560 = vmatmul.mubr.bf16.vlgmr.msra.gmra.mrb[12].mxu0 %v1879_v47 }
 0x4ab   :  { %2599 = vmatprep.mubr.msk.bf16.mxu0 %vm3176_vm4, %v3175_v10  ;;  %2584 = vmatpush3.bf16.msra.mxu0 %v2916_v50 }
 0x4ac   :  { %2585 = vmatprep.subr.bf16.mxu0 %v3175_v10 }
 0x4af   :  { %2586 = vmatpush3.bf16.msra.mxu0 %v2917_v22 }
 0x4b0   :  { %2587 = vmatprep.subr.bf16.mxu0 %v3175_v10 }
 0x4b3   :  { %2588 = vmatpush3.bf16.msra.mxu0 %v2918_v1 }
 0x4b4   :  { %2589 = vmatprep.subr.bf16.mxu0 %v3175_v10 }
 0x4b7   :  { %2590 = vmatpush3.bf16.msra.mxu0 %v2919_v51 }
 0x4b8   :  { %2591 = vmatprep.subr.bf16.mxu0 %v3175_v10 }
 0x4bb   :  { %2592 = vmatpush3.bf16.msra.mxu0 %v2920_v52 }
 0x4bc   :  { %2593 = vmatprep.subr.bf16.mxu0 %v3175_v10 }
 0x4bf   :  { %2594 = vmatpush3.bf16.msra.mxu0 %v2921_v53 }
 0x4c0   :  { %2595 = vmatprep.subr.bf16.mxu0 %v3175_v10 }
 0x4c3   :  { %2596 = vmatpush3.bf16.msra.mxu0 %v2922_v62 }
 0x4c4   :  { %2597 = vmatprep.subr.bf16.mxu0 %v3175_v10  ;;  %v2441_v10 = vld [vmem:[%s3512_s14] ss:$0 sm:$0xff] }
 0x4c7   :  { %2598 = vmatpush3.bf16.msra.mxu0 %v2923_v63 }
 0x57d   :  { %v1985_v55 = vpop.f32.mrb[12].mxu0 }
 0x57e   :  { %v1986_v56 = vadd.f32 %v2423_v54, %v1985_v55  ;;  %v2561_v57 = vpop.f32.mrb[13].mxu0 }
 0x57f   :  { %v1988_v58 = vpop.f32.mrb[14].mxu0 }
 0x580   :  { %v1991_v59 = vmax.f32 %v1986_v56, 0.0  ;;  %v2562_v60 = vpop.f32.mrb[15].mxu0 }
 0x582   :  { %v1992_v61 = vpack.c.bf16 %v1991_v59, %v1991_v59 }
 0x584   :  { %2580 = vmatmul.mubr.bf16.vlgmr.msra.gmra.mrb[16].mxu1 %v1992_v61 }
 0x657   :  { %v2098_v2 = vpop.f32.mrb[16].mxu1 }
 0x658   :  { %v2099_v3 = vadd.f32 %v2432_v0, %v2098_v2  ;;  %v2581_v4 = vpop.f32.mrb[17].mxu1 }
 0x659   :  { %v2101_v5 = vpop.f32.mrb[18].mxu1 }
 0x65a   :  { %vm2104_vm5 = vcmp.ge.f32.partialorder %v2099_v3, 0.0  ;;  %v2105_v6 = vmul.f32 0.22916667, %v2099_v3  ;;  %v2582_v7 = vpop.f32.mrb[19].mxu1 }
 0x65c   :  { %v2106_v8 = vsel %vm2104_vm5, %v2099_v3, %v2105_v6 }
 0x65d   :  { %v2107_v9 = vpack.c.bf16 %v2106_v8, %v2106_v8 }
 0x65f   :  { %2600 = vmatmul.mubr.bf16.vlgmr.msra.gmra.mrb[16].mxu0 %v2107_v9 }
 0x732   :  { %v2213_v11 = vpop.f32.mrb[16].mxu0 }
 0x733   :  { %v2214_v12 = vadd.f32 %v2441_v10, %v2213_v11  ;;  %v2601_v13 = vpop.f32.mrb[17].mxu0 }
 0x734   :  { %v2216_v14 = vpop.f32.mrb[18].mxu0 }
 0x735   :  { %2219 = vst [vmem:[%s3513_s15] sm:$0xff] %v2214_v12  ;;  %v2602_v15 = vpop.f32.mrb[19].mxu0 }
 0x736   :  { %2224 = vsyncpa [#allocation3], 1 }
 0x737   :  { %2225 = vsyncpa [#allocation5], 1 }
 0x738   :  { %2226 = vsyncpa [#allocation8], 1 }
 0x739   :  { %2227 = vsyncpa [#allocation11], 1 }
 0x73a   :  { %2228 = vsyncpa [#allocation14], 1 }
 0x73b   :  { %2229 = vsyncpa [#allocation17], 1 }

</bundles_post_ra>
